<compile_context>
chip_gen: v6e
topology: v6e:2x2x1
jax: 0.10.0
libtpu: 0.0.40
codegen_flags: <defaults>
</compile_context>

<pallas_src>
import functools

import jax
import jax.numpy as jnp
from jax import lax
from jax.experimental import pallas as pl
from jax.experimental.pallas import tpu as pltpu


# ---------------------------------------------------------------------------
# Fused kernel: one (image, row-tile) slab per grid step
# ---------------------------------------------------------------------------
def _fused_block_kernel(*refs, has_proj, th, wo, n_row_tiles, compute_dtype):
    if has_proj:
        (xm_ref, xt_ref, xb_ref, w1_ref, b1_ref, w2_ref, b2_ref,
         w3_ref, b3_ref, wsk_ref, bsk_ref, out_ref, h1pad_ref) = refs
    else:
        (xm_ref, xt_ref, xb_ref, w1_ref, b1_ref, w2_ref, b2_ref,
         w3_ref, b3_ref, out_ref, h1pad_ref) = refs
        wsk_ref = bsk_ref = None

    t = pl.program_id(1)
    cin = xm_ref.shape[-1]
    cmid = w1_ref.shape[1]
    cout = out_ref.shape[-1]
    m = th * wo

    w1 = w1_ref[...]
    b1 = b1_ref[...]

    x_main = xm_ref[0]                                    # (th, wo, cin), input dtype
    x_cd = x_main.reshape(m, cin).astype(compute_dtype)   # reused by stage 1 AND skip

    def conv1(x2d):                                       # 1x1 conv (BN folded) + ReLU
        h = jnp.dot(x2d, w1, preferred_element_type=jnp.float32)
        return jnp.maximum(h + b1, 0.0)

    # ---- stage 1: 1x1 conv (stride folded by wrapper) + BN + ReLU ---------
    h1_main = conv1(x_cd)                                          # (m, cmid) f32
    # 3x3 row halo: recompute the 1x1 conv for the adjacent row of each
    # neighbouring tile; zero at the image borders (padding=1 semantics).
    h1_top = conv1(xt_ref[0, 0].astype(compute_dtype))             # (wo, cmid)
    h1_bot = conv1(xb_ref[0, 0].astype(compute_dtype))
    h1_top = h1_top * (t > 0).astype(jnp.float32)
    h1_bot = h1_bot * (t < n_row_tiles - 1).astype(jnp.float32)

    # h1 halo scratch: interior + halo rows fully rewritten every step; only
    # the two halo COLUMNS are re-zeroed (cheap), so no cross-step scratch
    # dependence remains and both grid axes stay safely "parallel".
    dt = h1pad_ref.dtype
    zcol = jnp.zeros((th + 2, 1, cmid), dt)
    h1pad_ref[:, 0:1, :] = zcol
    h1pad_ref[:, wo + 1:wo + 2, :] = zcol
    h1pad_ref[0:1, 1:wo + 1, :] = h1_top.reshape(1, wo, cmid).astype(dt)
    h1pad_ref[th + 1:th + 2, 1:wo + 1, :] = h1_bot.reshape(1, wo, cmid).astype(dt)
    h1pad_ref[1:th + 1, 1:wo + 1, :] = h1_main.reshape(th, wo, cmid).astype(dt)

    # ---- stage 2: 3x3 conv as 9 accumulating MXU dots (no hcat pack) ------
    # TODO(synk): dx in {0,2} views are sublane-unaligned; an XLU variant
    # (pltpu.roll + edge mask on an unpadded buffer) would move the shifts off
    # the load/store slots on v5e/v6e.
    b2 = b2_ref[...]
    h2 = jnp.zeros((m, cmid), jnp.float32)
    for dy in range(3):
        for dx in range(3):
            win = h1pad_ref[dy:dy + th, dx:dx + wo, :]             # (th, wo, cmid)
            h2 = h2 + jnp.dot(win.reshape(m, cmid), w2_ref[dy * 3 + dx],
                              preferred_element_type=jnp.float32)
    h2 = jnp.maximum(h2 + b2, 0.0)

    # ---- stage 3: 1x1 conv + BN + ReLU (main branch ends with ReLU) -------
    y = jnp.dot(h2.astype(compute_dtype), w3_ref[...],
                preferred_element_type=jnp.float32)
    y = jnp.maximum(y + b3_ref[...], 0.0)

    # ---- residual add (NO ReLU after the add, per the PyTorch module) -----
    if has_proj:
        skip = jnp.dot(x_cd, wsk_ref[...],
                       preferred_element_type=jnp.float32) + bsk_ref[...]
    else:
        skip = x_main.reshape(m, cin).astype(jnp.float32)   # reuse loaded x slab
    out_ref[...] = (y + skip).reshape(1, th, wo, cout).astype(out_ref.dtype)


# ---------------------------------------------------------------------------
# Wrappers
# ---------------------------------------------------------------------------
def _pick_row_tile(ho, wo, cmax, itemsize, budget_bytes=2 << 20):
    """Largest divisor of `ho` whose per-tile slabs fit the budget; prefers at
    least two row tiles on taller images so the DMA pipeline has depth."""
    best = 1
    for th in range(1, ho + 1):
        if ho % th:
            continue
        if th == ho and ho > 8:              # prefer >=2 tiles when possible
            continue
        tile_bytes = (th + 2) * (wo + 2) * cmax * itemsize * 8
        if tile_bytes <= budget_bytes:
            best = th
    return best


def residual_block_forward_nhwc(x, params, s, *,
                                compute_dtype=jnp.bfloat16, row_tile=None):
    """Fused ResidualBlock forward on NHWC activations (transpose-free path)."""
    n, _, _, cin = x.shape
    cmid = params["w1"].shape[1]
    cout = params["w3"].shape[1]

    if s == 1:
        assert cin == cout, "identity skip requires input_channel == output_channel"
        xs = x
    else:
        # TODO(synk): fold the stride-s subsample into the BlockSpec/DMA (e.g.
        # a (N,Ho,s,Wo,s,C) view) instead of this XLA gather pass over x in HBM.
        xs = x[:, ::s, ::s, :]
    ho, wo = xs.shape[1], xs.shape[2]

    cd_size = jnp.dtype(compute_dtype).itemsize
    if row_tile is None:
        row_tile = _pick_row_tile(ho, wo, max(cin, cmid, cout), max(cd_size, 4))
    th = int(row_tile)
    assert ho % th == 0, f"row_tile={th} must divide output height {ho}"
    n_row_tiles = ho // th

    # fold eval-mode BN scale into the conv weights; bias stays a separate add
    w1f = (params["w1"] * params["s1"][None, :]).astype(compute_dtype)
    b1 = params["b1"].reshape(1, cmid).astype(jnp.float32)
    w2f = (params["w2"] * params["s2"][None, None, None, :]
           ).reshape(9, cmid, cmid).astype(compute_dtype)
    b2 = params["b2"].reshape(1, cmid).astype(jnp.float32)
    w3f = (params["w3"] * params["s3"][None, :]).astype(compute_dtype)
    b3 = params["b3"].reshape(1, cout).astype(jnp.float32)

    has_proj = (s != 1)
    consts = [w1f, b1, w2f, b2, w3f, b3]
    if has_proj:
        wskf = (params["wskip"] * params["sskip"][None, :]).astype(compute_dtype)
        bsk = params["bskip"].reshape(1, cout).astype(jnp.float32)
        consts += [wskf, bsk]
    inputs = [xs, xs, xs] + consts       # main rows, top halo row, bottom halo row

    x_specs = [
        pl.BlockSpec((1, th, wo, cin), lambda b, t: (b, t, 0, 0)),
        pl.BlockSpec((1, 1, wo, cin),
                     lambda b, t: (b, jnp.maximum(t * th - 1, 0), 0, 0)),
        pl.BlockSpec((1, 1, wo, cin),
                     lambda b, t: (b, jnp.minimum(t * th + th, ho - 1), 0, 0)),
    ]
    out_spec = pl.BlockSpec((1, th, wo, cout), lambda b, t: (b, t, 0, 0))

    # VMEM budget: double-buffered x/out tiles + single-buffered constants +
    # h1 halo scratch + f32 temporaries, with 2x headroom (32 MiB floor).
    io_bytes = 2 * 2 * ((th + 2) * wo * cin + th * wo * cout) * xs.dtype.itemsize
    const_bytes = sum(int(a.size) * a.dtype.itemsize for a in consts)
    scratch_bytes = (th + 2) * (wo + 2) * cmid * cd_size
    tmp_bytes = 6 * th * wo * max(cin, cmid, cout) * 4
    vmem_limit = int(min(max(2 * (io_bytes + const_bytes + scratch_bytes + tmp_bytes),
                             32 * 2 ** 20), 64 * 2 ** 20))

    flops = 2 * n * ho * wo * (cin * cmid + 9 * cmid * cmid + cmid * cout
                               + (cin * cout if has_proj else 0))
    bytes_accessed = int(xs.size * xs.dtype.itemsize
                         + n * ho * wo * cout * xs.dtype.itemsize + const_bytes)

    kernel = functools.partial(_fused_block_kernel, has_proj=has_proj, th=th,
                               wo=wo, n_row_tiles=n_row_tiles,
                               compute_dtype=compute_dtype)

    def call(single_buffer_consts):
        def cspec(a):
            idx = lambda b, t, _nd=a.ndim: (0,) * _nd
            if single_buffer_consts:
                # constant block index -> single-buffer to halve const VMEM
                return pl.BlockSpec(a.shape, idx, pipeline_mode=pl.Buffered(1))
            return pl.BlockSpec(a.shape, idx)

        return pl.pallas_call(
            kernel,
            out_shape=jax.ShapeDtypeStruct((n, ho, wo, cout), x.dtype),
            grid=(n, n_row_tiles),
            in_specs=x_specs + [cspec(a) for a in consts],
            out_specs=out_spec,
            scratch_shapes=[pltpu.VMEM((th + 2, wo + 2, cmid), compute_dtype)],
            compiler_params=pltpu.CompilerParams(
                dimension_semantics=("parallel", "parallel"),
                vmem_limit_bytes=vmem_limit),
            cost_estimate=pl.CostEstimate(flops=int(flops), transcendentals=0,
                                          bytes_accessed=bytes_accessed),
        )(*inputs)

    try:
        return call(single_buffer_consts=True)
    except Exception:  # fallback if per-BlockSpec buffering is unsupported
        return call(single_buffer_consts=False)


def residual_block_forward(x_nchw, params, s, *,
                           compute_dtype=jnp.bfloat16, row_tile=None):
    """PyTorch-parity (NCHW) wrapper around the NHWC fused kernel."""
    # TODO(synk): keep activations NHWC end-to-end across blocks so these two
    # full-HBM transpose passes disappear (use residual_block_forward_nhwc).
    x = jnp.transpose(x_nchw, (0, 2, 3, 1))
    y = residual_block_forward_nhwc(x, params, s, compute_dtype=compute_dtype,
                                    row_tile=row_tile)
    return jnp.transpose(y, (0, 3, 1, 2))


# ---------------------------------------------------------------------------
# Parameters (deterministic, PyTorch-shaped) + pure-JAX reference
# ---------------------------------------------------------------------------
def _fold_bn(gamma, beta, mean, var, eps=1e-5):
    scale = gamma / jnp.sqrt(var + eps)
    bias = beta - mean * scale
    return scale, bias


def init_params(key, cin, cmid, cout, s):
    ks = jax.random.split(key, 12)

    def bn_params(kg, kb, c):
        gamma = 1.0 + 0.1 * jax.random.normal(kg, (c,), jnp.float32)
        beta = 0.1 * jax.random.normal(kb, (c,), jnp.float32)
        mean = jnp.zeros((c,), jnp.float32)   # PyTorch running_mean init
        var = jnp.ones((c,), jnp.float32)     # PyTorch running_var init
        return _fold_bn(gamma, beta, mean, var)

    p = {}
    p["w1"] = 0.2 * jax.random.normal(ks[0], (cin, cmid), jnp.float32)          # 1x1
    p["s1"], p["b1"] = bn_params(ks[1], ks[2], cmid)
    p["w2"] = 0.2 * jax.random.normal(ks[3], (3, 3, cmid, cmid), jnp.float32)   # 3x3 HWIO
    p["s2"], p["b2"] = bn_params(ks[4], ks[5], cmid)
    p["w3"] = 0.2 * jax.random.normal(ks[6], (cmid, cout), jnp.float32)         # 1x1
    p["s3"], p["b3"] = bn_params(ks[7], ks[8], cout)
    if s != 1:
        p["wskip"] = 0.2 * jax.random.normal(ks[9], (cin, cout), jnp.float32)   # 1x1
        p["sskip"], p["bskip"] = bn_params(ks[10], ks[11], cout)
    return p


def ref_forward(x_nchw, p, s):
    dn = ("NHWC", "HWIO", "NHWC")
    x = jnp.transpose(x_nchw, (0, 2, 3, 1))
    cin = x.shape[-1]
    cmid = p["w1"].shape[1]
    cout = p["w3"].shape[1]
    h = lax.conv_general_dilated(x, p["w1"].reshape(1, 1, cin, cmid), (s, s),
                                 "VALID", dimension_numbers=dn)
    h = jnp.maximum(h * p["s1"] + p["b1"], 0.0)
    h = lax.conv_general_dilated(h, p["w2"], (1, 1), "SAME", dimension_numbers=dn)
    h = jnp.maximum(h * p["s2"] + p["b2"], 0.0)
    h = lax.conv_general_dilated(h, p["w3"].reshape(1, 1, cmid, cout), (1, 1),
                                 "VALID", dimension_numbers=dn)
    h = jnp.maximum(h * p["s3"] + p["b3"], 0.0)
    if s != 1:
        skip = lax.conv_general_dilated(x, p["wskip"].reshape(1, 1, cin, cout),
                                        (s, s), "VALID", dimension_numbers=dn)
        skip = skip * p["sskip"] + p["bskip"]
    else:
        skip = x
    return jnp.transpose(skip + h, (0, 3, 1, 2))


if __name__ == "__main__":
    key = jax.random.PRNGKey(0)
    k_x1, k_p1, k_x2, k_p2 = jax.random.split(key, 4)

    # case 1: stride 2, projection skip (4 -> 4 -> 8 channels), f32 operands
    x1 = jax.random.normal(k_x1, (2, 4, 16, 16), jnp.float32)
    p1 = init_params(k_p1, 4, 4, 8, s=2)
    y1 = jax.block_until_ready(
        residual_block_forward(x1, p1, s=2, compute_dtype=jnp.float32))
    r1 = ref_forward(x1, p1, s=2)
    assert y1.shape == (2, 8, 8, 8), y1.shape
    assert jnp.allclose(y1, r1, atol=1e-4, rtol=1e-4)

    # case 2: stride 1, identity skip; auto row tiling (2 row tiles of 8 rows)
    x2 = jax.random.normal(k_x2, (2, 4, 16, 16), jnp.float32)
    p2 = init_params(k_p2, 4, 4, 4, s=1)
    y2 = jax.block_until_ready(
        residual_block_forward(x2, p2, s=1, compute_dtype=jnp.float32))
    r2 = ref_forward(x2, p2, s=1)
    assert y2.shape == (2, 4, 16, 16), y2.shape
    assert jnp.allclose(y2, r2, atol=1e-4, rtol=1e-4)

    # case 3: forced finer tiling (4 row tiles of 4 rows) exercises the halo path
    y3 = jax.block_until_ready(
        residual_block_forward(x2, p2, s=1, compute_dtype=jnp.float32, row_tile=4))
    assert jnp.allclose(y3, r2, atol=1e-4, rtol=1e-4)

    # case 4: default bf16 operand path (f32 MXU accumulation), loose tolerance
    y4 = jax.block_until_ready(residual_block_forward(x1, p1, s=2))
    assert y4.shape == (2, 8, 8, 8), y4.shape
    assert jnp.allclose(y4, r1, atol=1e-1, rtol=1e-1)

    print("KERNEL_OK")
</pallas_src>

<mosaic_0001>
module attributes {stable_mosaic.version = 11 : i64} {
  func.func @_fused_block_kernel(%arg0: i32, %arg1: i32, %arg2: memref<1x8x8x4xf32, #tpu.memory_space<vmem>>, %arg3: memref<1x1x8x4xf32, #tpu.memory_space<vmem>>, %arg4: memref<1x1x8x4xf32, #tpu.memory_space<vmem>>, %arg5: memref<4x4xf32, #tpu.memory_space<vmem>>, %arg6: memref<1x4xf32, #tpu.memory_space<vmem>>, %arg7: memref<9x4x4xf32, #tpu.memory_space<vmem>>, %arg8: memref<1x4xf32, #tpu.memory_space<vmem>>, %arg9: memref<4x8xf32, #tpu.memory_space<vmem>>, %arg10: memref<1x8xf32, #tpu.memory_space<vmem>>, %arg11: memref<4x8xf32, #tpu.memory_space<vmem>>, %arg12: memref<1x8xf32, #tpu.memory_space<vmem>>, %arg13: memref<1x8x8x8xf32, #tpu.memory_space<vmem>>, %arg14: memref<10x10x4xf32, #tpu.memory_space<vmem>>) attributes {dimension_semantics = [#tpu.dimension_semantics<parallel>, #tpu.dimension_semantics<parallel>], iteration_bounds = array<i64: 2, 1>, scalar_prefetch = 0 : i64, scratch_operands = 1 : i64, tpu.core_type = #tpu.core_type<tc>, window_params = [{transform_indices = @transform_0, window_bounds = array<i64: 1, 8, 8, 4>}, {transform_indices = @transform_1, window_bounds = array<i64: 1, 1, 8, 4>}, {transform_indices = @transform_2, window_bounds = array<i64: 1, 1, 8, 4>}, {pipeline_mode = #tpu.pipeline_mode<synchronous>, transform_indices = @transform_3, window_bounds = array<i64: 4, 4>}, {pipeline_mode = #tpu.pipeline_mode<synchronous>, transform_indices = @transform_4, window_bounds = array<i64: 1, 4>}, {pipeline_mode = #tpu.pipeline_mode<synchronous>, transform_indices = @transform_5, window_bounds = array<i64: 9, 4, 4>}, {pipeline_mode = #tpu.pipeline_mode<synchronous>, transform_indices = @transform_6, window_bounds = array<i64: 1, 4>}, {pipeline_mode = #tpu.pipeline_mode<synchronous>, transform_indices = @transform_7, window_bounds = array<i64: 4, 8>}, {pipeline_mode = #tpu.pipeline_mode<synchronous>, transform_indices = @transform_8, window_bounds = array<i64: 1, 8>}, {pipeline_mode = #tpu.pipeline_mode<synchronous>, transform_indices = @transform_9, window_bounds = array<i64: 4, 8>}, {pipeline_mode = #tpu.pipeline_mode<synchronous>, transform_indices = @transform_10, window_bounds = array<i64: 1, 8>}, {transform_indices = @transform_11, window_bounds = array<i64: 1, 8, 8, 8>}]} {
    %c0 = arith.constant 0 : index
    %c0_0 = arith.constant 0 : index
    %0 = vector.load %arg5[%c0, %c0_0] : memref<4x4xf32, #tpu.memory_space<vmem>>, vector<4x4xf32>
    %c0_1 = arith.constant 0 : index
    %c0_2 = arith.constant 0 : index
    %1 = vector.load %arg6[%c0_1, %c0_2] : memref<1x4xf32, #tpu.memory_space<vmem>>, vector<1x4xf32>
    %c0_3 = arith.constant 0 : index
    %c0_4 = arith.constant 0 : index
    %c0_5 = arith.constant 0 : index
    %c0_6 = arith.constant 0 : index
    %2 = vector.load %arg2[%c0_3, %c0_4, %c0_5, %c0_6] : memref<1x8x8x4xf32, #tpu.memory_space<vmem>>, vector<1x8x8x4xf32>
    %3 = vector.shape_cast %2 : vector<1x8x8x4xf32> to vector<8x8x4xf32>
    %4 = vector.shape_cast %3 : vector<8x8x4xf32> to vector<64x4xf32>
    %cst = arith.constant dense<0.000000e+00> : vector<64x4xf32>
    %5 = tpu.matmul %4, %0, %cst {dimension_numbers = #tpu.dot_dimension_numbers<[1], [0], [0], [1], [0, 0, 1, 1], [], []>} : vector<64x4xf32>, vector<4x4xf32>, vector<64x4xf32> -> vector<64x4xf32>
    %6 = vector.broadcast %1 : vector<1x4xf32> to vector<64x4xf32>
    %7 = arith.addf %5, %6 : vector<64x4xf32>
    %cst_7 = arith.constant 0.000000e+00 : f32
    %8 = vector.broadcast %cst_7 : f32 to vector<64x4xf32>
    %9 = arith.maximumf %7, %8 : vector<64x4xf32>
    %c0_8 = arith.constant 0 : index
    %c0_9 = arith.constant 0 : index
    %c0_10 = arith.constant 0 : index
    %c0_11 = arith.constant 0 : index
    %10 = vector.load %arg3[%c0_8, %c0_9, %c0_10, %c0_11] : memref<1x1x8x4xf32, #tpu.memory_space<vmem>>, vector<1x1x8x4xf32>
    %11 = vector.shape_cast %10 : vector<1x1x8x4xf32> to vector<8x4xf32>
    %cst_12 = arith.constant dense<0.000000e+00> : vector<8x4xf32>
    %12 = tpu.matmul %11, %0, %cst_12 {dimension_numbers = #tpu.dot_dimension_numbers<[1], [0], [0], [1], [0, 0, 1, 1], [], []>} : vector<8x4xf32>, vector<4x4xf32>, vector<8x4xf32> -> vector<8x4xf32>
    %13 = vector.broadcast %1 : vector<1x4xf32> to vector<8x4xf32>
    %14 = arith.addf %12, %13 : vector<8x4xf32>
    %cst_13 = arith.constant 0.000000e+00 : f32
    %15 = vector.broadcast %cst_13 : f32 to vector<8x4xf32>
    %16 = arith.maximumf %14, %15 : vector<8x4xf32>
    %c0_14 = arith.constant 0 : index
    %c0_15 = arith.constant 0 : index
    %c0_16 = arith.constant 0 : index
    %c0_17 = arith.constant 0 : index
    %17 = vector.load %arg4[%c0_14, %c0_15, %c0_16, %c0_17] : memref<1x1x8x4xf32, #tpu.memory_space<vmem>>, vector<1x1x8x4xf32>
    %18 = vector.shape_cast %17 : vector<1x1x8x4xf32> to vector<8x4xf32>
    %cst_18 = arith.constant dense<0.000000e+00> : vector<8x4xf32>
    %19 = tpu.matmul %18, %0, %cst_18 {dimension_numbers = #tpu.dot_dimension_numbers<[1], [0], [0], [1], [0, 0, 1, 1], [], []>} : vector<8x4xf32>, vector<4x4xf32>, vector<8x4xf32> -> vector<8x4xf32>
    %20 = vector.broadcast %1 : vector<1x4xf32> to vector<8x4xf32>
    %21 = arith.addf %19, %20 : vector<8x4xf32>
    %cst_19 = arith.constant 0.000000e+00 : f32
    %22 = vector.broadcast %cst_19 : f32 to vector<8x4xf32>
    %23 = arith.maximumf %21, %22 : vector<8x4xf32>
    %c0_i32 = arith.constant 0 : i32
    %24 = arith.cmpi sgt, %arg1, %c0_i32 : i32
    %25 = arith.extui %24 : i1 to i32
    %26 = arith.sitofp %25 : i32 to f32
    %27 = vector.broadcast %26 : f32 to vector<8x4xf32>
    %28 = arith.mulf %16, %27 : vector<8x4xf32>
    %c0_i32_20 = arith.constant 0 : i32
    %29 = arith.cmpi slt, %arg1, %c0_i32_20 : i32
    %30 = arith.extui %29 : i1 to i32
    %31 = arith.sitofp %30 : i32 to f32
    %32 = vector.broadcast %31 : f32 to vector<8x4xf32>
    %33 = arith.mulf %23, %32 : vector<8x4xf32>
    %cst_21 = arith.constant 0.000000e+00 : f32
    %34 = vector.broadcast %cst_21 : f32 to vector<10x1x4xf32>
    %c0_22 = arith.constant 0 : index
    %c0_23 = arith.constant 0 : index
    %c0_24 = arith.constant 0 : index
    %35 = vector.load %arg14[%c0_22, %c0_23, %c0_24] : memref<10x10x4xf32, #tpu.memory_space<vmem>>, vector<10x1x4xf32>
    tpu.vector_store %arg14[%c0_22, %c0_23, %c0_24], %34 {strides = array<i32>} : memref<10x10x4xf32, #tpu.memory_space<vmem>>, vector<10x1x4xf32>,
    %c0_25 = arith.constant 0 : index
    %c9 = arith.constant 9 : index
    %c0_26 = arith.constant 0 : index
    %36 = vector.load %arg14[%c0_25, %c9, %c0_26] : memref<10x10x4xf32, #tpu.memory_space<vmem>>, vector<10x1x4xf32>
    tpu.vector_store %arg14[%c0_25, %c9, %c0_26], %34 {strides = array<i32>} : memref<10x10x4xf32, #tpu.memory_space<vmem>>, vector<10x1x4xf32>,
    %37 = vector.shape_cast %28 : vector<8x4xf32> to vector<1x8x4xf32>
    %c0_27 = arith.constant 0 : index
    %c1 = arith.constant 1 : index
    %c0_28 = arith.constant 0 : index
    %38 = vector.load %arg14[%c0_27, %c1, %c0_28] : memref<10x10x4xf32, #tpu.memory_space<vmem>>, vector<1x8x4xf32>
    tpu.vector_store %arg14[%c0_27, %c1, %c0_28], %37 {strides = array<i32>} : memref<10x10x4xf32, #tpu.memory_space<vmem>>, vector<1x8x4xf32>,
    %39 = vector.shape_cast %33 : vector<8x4xf32> to vector<1x8x4xf32>
    %c9_29 = arith.constant 9 : index
    %c1_30 = arith.constant 1 : index
    %c0_31 = arith.constant 0 : index
    %40 = vector.load %arg14[%c9_29, %c1_30, %c0_31] : memref<10x10x4xf32, #tpu.memory_space<vmem>>, vector<1x8x4xf32>
    tpu.vector_store %arg14[%c9_29, %c1_30, %c0_31], %39 {strides = array<i32>} : memref<10x10x4xf32, #tpu.memory_space<vmem>>, vector<1x8x4xf32>,
    %41 = vector.shape_cast %9 : vector<64x4xf32> to vector<8x8x4xf32>
    %c1_32 = arith.constant 1 : index
    %c1_33 = arith.constant 1 : index
    %c0_34 = arith.constant 0 : index
    %42 = vector.load %arg14[%c1_32, %c1_33, %c0_34] : memref<10x10x4xf32, #tpu.memory_space<vmem>>, vector<8x8x4xf32>
    tpu.vector_store %arg14[%c1_32, %c1_33, %c0_34], %41 {strides = array<i32>} : memref<10x10x4xf32, #tpu.memory_space<vmem>>, vector<8x8x4xf32>,
    %c0_35 = arith.constant 0 : index
    %c0_36 = arith.constant 0 : index
    %43 = vector.load %arg8[%c0_35, %c0_36] : memref<1x4xf32, #tpu.memory_space<vmem>>, vector<1x4xf32>
    %cst_37 = arith.constant 0.000000e+00 : f32
    %44 = vector.broadcast %cst_37 : f32 to vector<64x4xf32>
    %c0_38 = arith.constant 0 : index
    %c0_39 = arith.constant 0 : index
    %c0_40 = arith.constant 0 : index
    %45 = vector.load %arg14[%c0_38, %c0_39, %c0_40] : memref<10x10x4xf32, #tpu.memory_space<vmem>>, vector<8x8x4xf32>
    %46 = vector.shape_cast %45 : vector<8x8x4xf32> to vector<64x4xf32>
    %c0_41 = arith.constant 0 : index
    %c0_42 = arith.constant 0 : index
    %c0_43 = arith.constant 0 : index
    %47 = vector.load %arg7[%c0_41, %c0_42, %c0_43] : memref<9x4x4xf32, #tpu.memory_space<vmem>>, vector<1x4x4xf32>
    %48 = vector.shape_cast %47 : vector<1x4x4xf32> to vector<4x4xf32>
    %cst_44 = arith.constant dense<0.000000e+00> : vector<64x4xf32>
    %49 = tpu.matmul %46, %48, %cst_44 {dimension_numbers = #tpu.dot_dimension_numbers<[1], [0], [0], [1], [0, 0, 1, 1], [], []>} : vector<64x4xf32>, vector<4x4xf32>, vector<64x4xf32> -> vector<64x4xf32>
    %50 = arith.addf %44, %49 : vector<64x4xf32>
    %c0_45 = arith.constant 0 : index
    %c1_46 = arith.constant 1 : index
    %c0_47 = arith.constant 0 : index
    %51 = vector.load %arg14[%c0_45, %c1_46, %c0_47] : memref<10x10x4xf32, #tpu.memory_space<vmem>>, vector<8x8x4xf32>
    %52 = vector.shape_cast %51 : vector<8x8x4xf32> to vector<64x4xf32>
    %c1_48 = arith.constant 1 : index
    %c0_49 = arith.constant 0 : index
    %c0_50 = arith.constant 0 : index
    %53 = vector.load %arg7[%c1_48, %c0_49, %c0_50] : memref<9x4x4xf32, #tpu.memory_space<vmem>>, vector<1x4x4xf32>
    %54 = vector.shape_cast %53 : vector<1x4x4xf32> to vector<4x4xf32>
    %cst_51 = arith.constant dense<0.000000e+00> : vector<64x4xf32>
    %55 = tpu.matmul %52, %54, %cst_51 {dimension_numbers = #tpu.dot_dimension_numbers<[1], [0], [0], [1], [0, 0, 1, 1], [], []>} : vector<64x4xf32>, vector<4x4xf32>, vector<64x4xf32> -> vector<64x4xf32>
    %56 = arith.addf %50, %55 : vector<64x4xf32>
    %c0_52 = arith.constant 0 : index
    %c2 = arith.constant 2 : index
    %c0_53 = arith.constant 0 : index
    %57 = vector.load %arg14[%c0_52, %c2, %c0_53] : memref<10x10x4xf32, #tpu.memory_space<vmem>>, vector<8x8x4xf32>
    %58 = vector.shape_cast %57 : vector<8x8x4xf32> to vector<64x4xf32>
    %c2_54 = arith.constant 2 : index
    %c0_55 = arith.constant 0 : index
    %c0_56 = arith.constant 0 : index
    %59 = vector.load %arg7[%c2_54, %c0_55, %c0_56] : memref<9x4x4xf32, #tpu.memory_space<vmem>>, vector<1x4x4xf32>
    %60 = vector.shape_cast %59 : vector<1x4x4xf32> to vector<4x4xf32>
    %cst_57 = arith.constant dense<0.000000e+00> : vector<64x4xf32>
    %61 = tpu.matmul %58, %60, %cst_57 {dimension_numbers = #tpu.dot_dimension_numbers<[1], [0], [0], [1], [0, 0, 1, 1], [], []>} : vector<64x4xf32>, vector<4x4xf32>, vector<64x4xf32> -> vector<64x4xf32>
    %62 = arith.addf %56, %61 : vector<64x4xf32>
    %c1_58 = arith.constant 1 : index
    %c0_59 = arith.constant 0 : index
    %c0_60 = arith.constant 0 : index
    %63 = vector.load %arg14[%c1_58, %c0_59, %c0_60] : memref<10x10x4xf32, #tpu.memory_space<vmem>>, vector<8x8x4xf32>
    %64 = vector.shape_cast %63 : vector<8x8x4xf32> to vector<64x4xf32>
    %c3 = arith.constant 3 : index
    %c0_61 = arith.constant 0 : index
    %c0_62 = arith.constant 0 : index
    %65 = vector.load %arg7[%c3, %c0_61, %c0_62] : memref<9x4x4xf32, #tpu.memory_space<vmem>>, vector<1x4x4xf32>
    %66 = vector.shape_cast %65 : vector<1x4x4xf32> to vector<4x4xf32>
    %cst_63 = arith.constant dense<0.000000e+00> : vector<64x4xf32>
    %67 = tpu.matmul %64, %66, %cst_63 {dimension_numbers = #tpu.dot_dimension_numbers<[1], [0], [0], [1], [0, 0, 1, 1], [], []>} : vector<64x4xf32>, vector<4x4xf32>, vector<64x4xf32> -> vector<64x4xf32>
    %68 = arith.addf %62, %67 : vector<64x4xf32>
    %c1_64 = arith.constant 1 : index
    %c1_65 = arith.constant 1 : index
    %c0_66 = arith.constant 0 : index
    %69 = vector.load %arg14[%c1_64, %c1_65, %c0_66] : memref<10x10x4xf32, #tpu.memory_space<vmem>>, vector<8x8x4xf32>
    %70 = vector.shape_cast %69 : vector<8x8x4xf32> to vector<64x4xf32>
    %c4 = arith.constant 4 : index
    %c0_67 = arith.constant 0 : index
    %c0_68 = arith.constant 0 : index
    %71 = vector.load %arg7[%c4, %c0_67, %c0_68] : memref<9x4x4xf32, #tpu.memory_space<vmem>>, vector<1x4x4xf32>
    %72 = vector.shape_cast %71 : vector<1x4x4xf32> to vector<4x4xf32>
    %cst_69 = arith.constant dense<0.000000e+00> : vector<64x4xf32>
    %73 = tpu.matmul %70, %72, %cst_69 {dimension_numbers = #tpu.dot_dimension_numbers<[1], [0], [0], [1], [0, 0, 1, 1], [], []>} : vector<64x4xf32>, vector<4x4xf32>, vector<64x4xf32> -> vector<64x4xf32>
    %74 = arith.addf %68, %73 : vector<64x4xf32>
    %c1_70 = arith.constant 1 : index
    %c2_71 = arith.constant 2 : index
    %c0_72 = arith.constant 0 : index
    %75 = vector.load %arg14[%c1_70, %c2_71, %c0_72] : memref<10x10x4xf32, #tpu.memory_space<vmem>>, vector<8x8x4xf32>
    %76 = vector.shape_cast %75 : vector<8x8x4xf32> to vector<64x4xf32>
    %c5 = arith.constant 5 : index
    %c0_73 = arith.constant 0 : index
    %c0_74 = arith.constant 0 : index
    %77 = vector.load %arg7[%c5, %c0_73, %c0_74] : memref<9x4x4xf32, #tpu.memory_space<vmem>>, vector<1x4x4xf32>
    %78 = vector.shape_cast %77 : vector<1x4x4xf32> to vector<4x4xf32>
    %cst_75 = arith.constant dense<0.000000e+00> : vector<64x4xf32>
    %79 = tpu.matmul %76, %78, %cst_75 {dimension_numbers = #tpu.dot_dimension_numbers<[1], [0], [0], [1], [0, 0, 1, 1], [], []>} : vector<64x4xf32>, vector<4x4xf32>, vector<64x4xf32> -> vector<64x4xf32>
    %80 = arith.addf %74, %79 : vector<64x4xf32>
    %c2_76 = arith.constant 2 : index
    %c0_77 = arith.constant 0 : index
    %c0_78 = arith.constant 0 : index
    %81 = vector.load %arg14[%c2_76, %c0_77, %c0_78] : memref<10x10x4xf32, #tpu.memory_space<vmem>>, vector<8x8x4xf32>
    %82 = vector.shape_cast %81 : vector<8x8x4xf32> to vector<64x4xf32>
    %c6 = arith.constant 6 : index
    %c0_79 = arith.constant 0 : index
    %c0_80 = arith.constant 0 : index
    %83 = vector.load %arg7[%c6, %c0_79, %c0_80] : memref<9x4x4xf32, #tpu.memory_space<vmem>>, vector<1x4x4xf32>
    %84 = vector.shape_cast %83 : vector<1x4x4xf32> to vector<4x4xf32>
    %cst_81 = arith.constant dense<0.000000e+00> : vector<64x4xf32>
    %85 = tpu.matmul %82, %84, %cst_81 {dimension_numbers = #tpu.dot_dimension_numbers<[1], [0], [0], [1], [0, 0, 1, 1], [], []>} : vector<64x4xf32>, vector<4x4xf32>, vector<64x4xf32> -> vector<64x4xf32>
    %86 = arith.addf %80, %85 : vector<64x4xf32>
    %c2_82 = arith.constant 2 : index
    %c1_83 = arith.constant 1 : index
    %c0_84 = arith.constant 0 : index
    %87 = vector.load %arg14[%c2_82, %c1_83, %c0_84] : memref<10x10x4xf32, #tpu.memory_space<vmem>>, vector<8x8x4xf32>
    %88 = vector.shape_cast %87 : vector<8x8x4xf32> to vector<64x4xf32>
    %c7 = arith.constant 7 : index
    %c0_85 = arith.constant 0 : index
    %c0_86 = arith.constant 0 : index
    %89 = vector.load %arg7[%c7, %c0_85, %c0_86] : memref<9x4x4xf32, #tpu.memory_space<vmem>>, vector<1x4x4xf32>
    %90 = vector.shape_cast %89 : vector<1x4x4xf32> to vector<4x4xf32>
    %cst_87 = arith.constant dense<0.000000e+00> : vector<64x4xf32>
    %91 = tpu.matmul %88, %90, %cst_87 {dimension_numbers = #tpu.dot_dimension_numbers<[1], [0], [0], [1], [0, 0, 1, 1], [], []>} : vector<64x4xf32>, vector<4x4xf32>, vector<64x4xf32> -> vector<64x4xf32>
    %92 = arith.addf %86, %91 : vector<64x4xf32>
    %c2_88 = arith.constant 2 : index
    %c2_89 = arith.constant 2 : index
    %c0_90 = arith.constant 0 : index
    %93 = vector.load %arg14[%c2_88, %c2_89, %c0_90] : memref<10x10x4xf32, #tpu.memory_space<vmem>>, vector<8x8x4xf32>
    %94 = vector.shape_cast %93 : vector<8x8x4xf32> to vector<64x4xf32>
    %c8 = arith.constant 8 : index
    %c0_91 = arith.constant 0 : index
    %c0_92 = arith.constant 0 : index
    %95 = vector.load %arg7[%c8, %c0_91, %c0_92] : memref<9x4x4xf32, #tpu.memory_space<vmem>>, vector<1x4x4xf32>
    %96 = vector.shape_cast %95 : vector<1x4x4xf32> to vector<4x4xf32>
    %cst_93 = arith.constant dense<0.000000e+00> : vector<64x4xf32>
    %97 = tpu.matmul %94, %96, %cst_93 {dimension_numbers = #tpu.dot_dimension_numbers<[1], [0], [0], [1], [0, 0, 1, 1], [], []>} : vector<64x4xf32>, vector<4x4xf32>, vector<64x4xf32> -> vector<64x4xf32>
    %98 = arith.addf %92, %97 : vector<64x4xf32>
    %99 = vector.broadcast %43 : vector<1x4xf32> to vector<64x4xf32>
    %100 = arith.addf %98, %99 : vector<64x4xf32>
    %cst_94 = arith.constant 0.000000e+00 : f32
    %101 = vector.broadcast %cst_94 : f32 to vector<64x4xf32>
    %102 = arith.maximumf %100, %101 : vector<64x4xf32>
    %c0_95 = arith.constant 0 : index
    %c0_96 = arith.constant 0 : index
    %103 = vector.load %arg9[%c0_95, %c0_96] : memref<4x8xf32, #tpu.memory_space<vmem>>, vector<4x8xf32>
    %cst_97 = arith.constant dense<0.000000e+00> : vector<64x8xf32>
    %104 = tpu.matmul %102, %103, %cst_97 {dimension_numbers = #tpu.dot_dimension_numbers<[1], [0], [0], [1], [0, 0, 1, 1], [], []>} : vector<64x4xf32>, vector<4x8xf32>, vector<64x8xf32> -> vector<64x8xf32>
    %c0_98 = arith.constant 0 : index
    %c0_99 = arith.constant 0 : index
    %105 = vector.load %arg10[%c0_98, %c0_99] : memref<1x8xf32, #tpu.memory_space<vmem>>, vector<1x8xf32>
    %106 = vector.broadcast %105 : vector<1x8xf32> to vector<64x8xf32>
    %107 = arith.addf %104, %106 : vector<64x8xf32>
    %cst_100 = arith.constant 0.000000e+00 : f32
    %108 = vector.broadcast %cst_100 : f32 to vector<64x8xf32>
    %109 = arith.maximumf %107, %108 : vector<64x8xf32>
    %c0_101 = arith.constant 0 : index
    %c0_102 = arith.constant 0 : index
    %110 = vector.load %arg11[%c0_101, %c0_102] : memref<4x8xf32, #tpu.memory_space<vmem>>, vector<4x8xf32>
    %cst_103 = arith.constant dense<0.000000e+00> : vector<64x8xf32>
    %111 = tpu.matmul %4, %110, %cst_103 {dimension_numbers = #tpu.dot_dimension_numbers<[1], [0], [0], [1], [0, 0, 1, 1], [], []>} : vector<64x4xf32>, vector<4x8xf32>, vector<64x8xf32> -> vector<64x8xf32>
    %c0_104 = arith.constant 0 : index
    %c0_105 = arith.constant 0 : index
    %112 = vector.load %arg12[%c0_104, %c0_105] : memref<1x8xf32, #tpu.memory_space<vmem>>, vector<1x8xf32>
    %113 = vector.broadcast %112 : vector<1x8xf32> to vector<64x8xf32>
    %114 = arith.addf %111, %113 : vector<64x8xf32>
    %115 = arith.addf %109, %114 : vector<64x8xf32>
    %116 = vector.shape_cast %115 : vector<64x8xf32> to vector<1x8x8x8xf32>
    %c0_106 = arith.constant 0 : index
    %c0_107 = arith.constant 0 : index
    %c0_108 = arith.constant 0 : index
    %c0_109 = arith.constant 0 : index
    %117 = vector.load %arg13[%c0_106, %c0_107, %c0_108, %c0_109] : memref<1x8x8x8xf32, #tpu.memory_space<vmem>>, vector<1x8x8x8xf32>
    tpu.vector_store %arg13[%c0_106, %c0_107, %c0_108, %c0_109], %116 {strides = array<i32>} : memref<1x8x8x8xf32, #tpu.memory_space<vmem>>, vector<1x8x8x8xf32>,
    return
  }
  func.func @transform_0(%arg0: i32, %arg1: i32) -> (i32, i32, i32, i32) {
    %c0_i32 = arith.constant 0 : i32
    %c0_i32_0 = arith.constant 0 : i32
    %c0_i32_1 = arith.constant 0 : i32
    return %arg0, %arg1, %c0_i32, %c0_i32_0 : i32, i32, i32, i32
  }
  func.func @transform_1(%arg0: i32, %arg1: i32) -> (i32, i32, i32, i32) {
    %c8_i32 = arith.constant 8 : i32
    %0 = arith.muli %arg1, %c8_i32 : i32
    %c1_i32 = arith.constant 1 : i32
    %1 = arith.subi %0, %c1_i32 : i32
    %c0_i32 = arith.constant 0 : i32
    %2 = arith.maxsi %1, %c0_i32 : i32
    %c0_i32_0 = arith.constant 0 : i32
    %c0_i32_1 = arith.constant 0 : i32
    %c0_i32_2 = arith.constant 0 : i32
    return %arg0, %2, %c0_i32_0, %c0_i32_1 : i32, i32, i32, i32
  }
  func.func @transform_2(%arg0: i32, %arg1: i32) -> (i32, i32, i32, i32) {
    %c8_i32 = arith.constant 8 : i32
    %0 = arith.muli %arg1, %c8_i32 : i32
    %c8_i32_0 = arith.constant 8 : i32
    %1 = arith.addi %0, %c8_i32_0 : i32
    %c7_i32 = arith.constant 7 : i32
    %2 = arith.minsi %1, %c7_i32 : i32
    %c0_i32 = arith.constant 0 : i32
    %c0_i32_1 = arith.constant 0 : i32
    %c0_i32_2 = arith.constant 0 : i32
    return %arg0, %2, %c0_i32, %c0_i32_1 : i32, i32, i32, i32
  }
  func.func @transform_3(%arg0: i32, %arg1: i32) -> (i32, i32) {
    %c0_i32 = arith.constant 0 : i32
    %c0_i32_0 = arith.constant 0 : i32
    %c0_i32_1 = arith.constant 0 : i32
    return %c0_i32, %c0_i32_0 : i32, i32
  }
  func.func @transform_4(%arg0: i32, %arg1: i32) -> (i32, i32) {
    %c0_i32 = arith.constant 0 : i32
    %c0_i32_0 = arith.constant 0 : i32
    %c0_i32_1 = arith.constant 0 : i32
    return %c0_i32, %c0_i32_0 : i32, i32
  }
  func.func @transform_5(%arg0: i32, %arg1: i32) -> (i32, i32, i32) {
    %c0_i32 = arith.constant 0 : i32
    %c0_i32_0 = arith.constant 0 : i32
    %c0_i32_1 = arith.constant 0 : i32
    %c0_i32_2 = arith.constant 0 : i32
    return %c0_i32, %c0_i32_0, %c0_i32_1 : i32, i32, i32
  }
  func.func @transform_6(%arg0: i32, %arg1: i32) -> (i32, i32) {
    %c0_i32 = arith.constant 0 : i32
    %c0_i32_0 = arith.constant 0 : i32
    %c0_i32_1 = arith.constant 0 : i32
    return %c0_i32, %c0_i32_0 : i32, i32
  }
  func.func @transform_7(%arg0: i32, %arg1: i32) -> (i32, i32) {
    %c0_i32 = arith.constant 0 : i32
    %c0_i32_0 = arith.constant 0 : i32
    %c0_i32_1 = arith.constant 0 : i32
    return %c0_i32, %c0_i32_0 : i32, i32
  }
  func.func @transform_8(%arg0: i32, %arg1: i32) -> (i32, i32) {
    %c0_i32 = arith.constant 0 : i32
    %c0_i32_0 = arith.constant 0 : i32
    %c0_i32_1 = arith.constant 0 : i32
    return %c0_i32, %c0_i32_0 : i32, i32
  }
  func.func @transform_9(%arg0: i32, %arg1: i32) -> (i32, i32) {
    %c0_i32 = arith.constant 0 : i32
    %c0_i32_0 = arith.constant 0 : i32
    %c0_i32_1 = arith.constant 0 : i32
    return %c0_i32, %c0_i32_0 : i32, i32
  }
  func.func @transform_10(%arg0: i32, %arg1: i32) -> (i32, i32) {
    %c0_i32 = arith.constant 0 : i32
    %c0_i32_0 = arith.constant 0 : i32
    %c0_i32_1 = arith.constant 0 : i32
    return %c0_i32, %c0_i32_0 : i32, i32
  }
  func.func @transform_11(%arg0: i32, %arg1: i32) -> (i32, i32, i32, i32) {
    %c0_i32 = arith.constant 0 : i32
    %c0_i32_0 = arith.constant 0 : i32
    %c0_i32_1 = arith.constant 0 : i32
    return %arg0, %arg1, %c0_i32, %c0_i32_0 : i32, i32, i32, i32
  }
}

module attributes {stable_mosaic.version = 11 : i64} {
  func.func @_fused_block_kernel(%arg0: i32, %arg1: i32, %arg2: memref<1x8x8x4xf32, #tpu.memory_space<vmem>>, %arg3: memref<1x1x8x4xf32, #tpu.memory_space<vmem>>, %arg4: memref<1x1x8x4xf32, #tpu.memory_space<vmem>>, %arg5: memref<4x4xf32, #tpu.memory_space<vmem>>, %arg6: memref<1x4xf32, #tpu.memory_space<vmem>>, %arg7: memref<9x4x4xf32, #tpu.memory_space<vmem>>, %arg8: memref<1x4xf32, #tpu.memory_space<vmem>>, %arg9: memref<4x8xf32, #tpu.memory_space<vmem>>, %arg10: memref<1x8xf32, #tpu.memory_space<vmem>>, %arg11: memref<4x8xf32, #tpu.memory_space<vmem>>, %arg12: memref<1x8xf32, #tpu.memory_space<vmem>>, %arg13: memref<1x8x8x8xf32, #tpu.memory_space<vmem>>, %arg14: memref<10x10x4xf32, #tpu.memory_space<vmem>>) attributes {dimension_semantics = [#tpu.dimension_semantics<parallel>, #tpu.dimension_semantics<parallel>], iteration_bounds = array<i64: 2, 1>, scalar_prefetch = 0 : i64, scratch_operands = 1 : i64, tpu.core_type = #tpu.core_type<tc>, window_params = [{transform_indices = @transform_0, window_bounds = array<i64: 1, 8, 8, 4>}, {transform_indices = @transform_1, window_bounds = array<i64: 1, 1, 8, 4>}, {transform_indices = @transform_2, window_bounds = array<i64: 1, 1, 8, 4>}, {pipeline_mode = #tpu.pipeline_mode<synchronous>, transform_indices = @transform_3, window_bounds = array<i64: 4, 4>}, {pipeline_mode = #tpu.pipeline_mode<synchronous>, transform_indices = @transform_4, window_bounds = array<i64: 1, 4>}, {pipeline_mode = #tpu.pipeline_mode<synchronous>, transform_indices = @transform_5, window_bounds = array<i64: 9, 4, 4>}, {pipeline_mode = #tpu.pipeline_mode<synchronous>, transform_indices = @transform_6, window_bounds = array<i64: 1, 4>}, {pipeline_mode = #tpu.pipeline_mode<synchronous>, transform_indices = @transform_7, window_bounds = array<i64: 4, 8>}, {pipeline_mode = #tpu.pipeline_mode<synchronous>, transform_indices = @transform_8, window_bounds = array<i64: 1, 8>}, {pipeline_mode = #tpu.pipeline_mode<synchronous>, transform_indices = @transform_9, window_bounds = array<i64: 4, 8>}, {pipeline_mode = #tpu.pipeline_mode<synchronous>, transform_indices = @transform_10, window_bounds = array<i64: 1, 8>}, {transform_indices = @transform_11, window_bounds = array<i64: 1, 8, 8, 8>}]} {
    %c0 = arith.constant 0 : index
    %c0_0 = arith.constant 0 : index
    %0 = vector.load %arg5[%c0, %c0_0] : memref<4x4xf32, #tpu.memory_space<vmem>>, vector<4x4xf32>
    %c0_1 = arith.constant 0 : index
    %c0_2 = arith.constant 0 : index
    %1 = vector.load %arg6[%c0_1, %c0_2] : memref<1x4xf32, #tpu.memory_space<vmem>>, vector<1x4xf32>
    %c0_3 = arith.constant 0 : index
    %c0_4 = arith.constant 0 : index
    %c0_5 = arith.constant 0 : index
    %c0_6 = arith.constant 0 : index
    %2 = vector.load %arg2[%c0_3, %c0_4, %c0_5, %c0_6] : memref<1x8x8x4xf32, #tpu.memory_space<vmem>>, vector<1x8x8x4xf32>
    %3 = vector.shape_cast %2 : vector<1x8x8x4xf32> to vector<8x8x4xf32>
    %4 = vector.shape_cast %3 : vector<8x8x4xf32> to vector<64x4xf32>
    %cst = arith.constant dense<0.000000e+00> : vector<64x4xf32>
    %5 = tpu.matmul %4, %0, %cst {dimension_numbers = #tpu.dot_dimension_numbers<[1], [0], [0], [1], [0, 0, 1, 1], [], []>} : vector<64x4xf32>, vector<4x4xf32>, vector<64x4xf32> -> vector<64x4xf32>
    %6 = vector.broadcast %1 : vector<1x4xf32> to vector<64x4xf32>
    %7 = arith.addf %5, %6 : vector<64x4xf32>
    %cst_7 = arith.constant 0.000000e+00 : f32
    %8 = vector.broadcast %cst_7 : f32 to vector<64x4xf32>
    %9 = arith.maximumf %7, %8 : vector<64x4xf32>
    %c0_8 = arith.constant 0 : index
    %c0_9 = arith.constant 0 : index
    %c0_10 = arith.constant 0 : index
    %c0_11 = arith.constant 0 : index
    %10 = vector.load %arg3[%c0_8, %c0_9, %c0_10, %c0_11] : memref<1x1x8x4xf32, #tpu.memory_space<vmem>>, vector<1x1x8x4xf32>
    %11 = vector.shape_cast %10 : vector<1x1x8x4xf32> to vector<8x4xf32>
    %cst_12 = arith.constant dense<0.000000e+00> : vector<8x4xf32>
    %12 = tpu.matmul %11, %0, %cst_12 {dimension_numbers = #tpu.dot_dimension_numbers<[1], [0], [0], [1], [0, 0, 1, 1], [], []>} : vector<8x4xf32>, vector<4x4xf32>, vector<8x4xf32> -> vector<8x4xf32>
    %13 = vector.broadcast %1 : vector<1x4xf32> to vector<8x4xf32>
    %14 = arith.addf %12, %13 : vector<8x4xf32>
    %cst_13 = arith.constant 0.000000e+00 : f32
    %15 = vector.broadcast %cst_13 : f32 to vector<8x4xf32>
    %16 = arith.maximumf %14, %15 : vector<8x4xf32>
    %c0_14 = arith.constant 0 : index
    %c0_15 = arith.constant 0 : index
    %c0_16 = arith.constant 0 : index
    %c0_17 = arith.constant 0 : index
    %17 = vector.load %arg4[%c0_14, %c0_15, %c0_16, %c0_17] : memref<1x1x8x4xf32, #tpu.memory_space<vmem>>, vector<1x1x8x4xf32>
    %18 = vector.shape_cast %17 : vector<1x1x8x4xf32> to vector<8x4xf32>
    %cst_18 = arith.constant dense<0.000000e+00> : vector<8x4xf32>
    %19 = tpu.matmul %18, %0, %cst_18 {dimension_numbers = #tpu.dot_dimension_numbers<[1], [0], [0], [1], [0, 0, 1, 1], [], []>} : vector<8x4xf32>, vector<4x4xf32>, vector<8x4xf32> -> vector<8x4xf32>
    %20 = vector.broadcast %1 : vector<1x4xf32> to vector<8x4xf32>
    %21 = arith.addf %19, %20 : vector<8x4xf32>
    %cst_19 = arith.constant 0.000000e+00 : f32
    %22 = vector.broadcast %cst_19 : f32 to vector<8x4xf32>
    %23 = arith.maximumf %21, %22 : vector<8x4xf32>
    %c0_i32 = arith.constant 0 : i32
    %24 = arith.cmpi sgt, %arg1, %c0_i32 : i32
    %25 = arith.extui %24 : i1 to i32
    %26 = arith.sitofp %25 : i32 to f32
    %27 = vector.broadcast %26 : f32 to vector<8x4xf32>
    %28 = arith.mulf %16, %27 : vector<8x4xf32>
    %c0_i32_20 = arith.constant 0 : i32
    %29 = arith.cmpi slt, %arg1, %c0_i32_20 : i32
    %30 = arith.extui %29 : i1 to i32
    %31 = arith.sitofp %30 : i32 to f32
    %32 = vector.broadcast %31 : f32 to vector<8x4xf32>
    %33 = arith.mulf %23, %32 : vector<8x4xf32>
    %cst_21 = arith.constant 0.000000e+00 : f32
    %34 = vector.broadcast %cst_21 : f32 to vector<10x1x4xf32>
    %c0_22 = arith.constant 0 : index
    %c0_23 = arith.constant 0 : index
    %c0_24 = arith.constant 0 : index
    %35 = vector.load %arg14[%c0_22, %c0_23, %c0_24] : memref<10x10x4xf32, #tpu.memory_space<vmem>>, vector<10x1x4xf32>
    tpu.vector_store %arg14[%c0_22, %c0_23, %c0_24], %34 {strides = array<i32>} : memref<10x10x4xf32, #tpu.memory_space<vmem>>, vector<10x1x4xf32>,
    %c0_25 = arith.constant 0 : index
    %c9 = arith.constant 9 : index
    %c0_26 = arith.constant 0 : index
    %36 = vector.load %arg14[%c0_25, %c9, %c0_26] : memref<10x10x4xf32, #tpu.memory_space<vmem>>, vector<10x1x4xf32>
    tpu.vector_store %arg14[%c0_25, %c9, %c0_26], %34 {strides = array<i32>} : memref<10x10x4xf32, #tpu.memory_space<vmem>>, vector<10x1x4xf32>,
    %37 = vector.shape_cast %28 : vector<8x4xf32> to vector<1x8x4xf32>
    %c0_27 = arith.constant 0 : index
    %c1 = arith.constant 1 : index
    %c0_28 = arith.constant 0 : index
    %38 = vector.load %arg14[%c0_27, %c1, %c0_28] : memref<10x10x4xf32, #tpu.memory_space<vmem>>, vector<1x8x4xf32>
    tpu.vector_store %arg14[%c0_27, %c1, %c0_28], %37 {strides = array<i32>} : memref<10x10x4xf32, #tpu.memory_space<vmem>>, vector<1x8x4xf32>,
    %39 = vector.shape_cast %33 : vector<8x4xf32> to vector<1x8x4xf32>
    %c9_29 = arith.constant 9 : index
    %c1_30 = arith.constant 1 : index
    %c0_31 = arith.constant 0 : index
    %40 = vector.load %arg14[%c9_29, %c1_30, %c0_31] : memref<10x10x4xf32, #tpu.memory_space<vmem>>, vector<1x8x4xf32>
    tpu.vector_store %arg14[%c9_29, %c1_30, %c0_31], %39 {strides = array<i32>} : memref<10x10x4xf32, #tpu.memory_space<vmem>>, vector<1x8x4xf32>,
    %41 = vector.shape_cast %9 : vector<64x4xf32> to vector<8x8x4xf32>
    %c1_32 = arith.constant 1 : index
    %c1_33 = arith.constant 1 : index
    %c0_34 = arith.constant 0 : index
    %42 = vector.load %arg14[%c1_32, %c1_33, %c0_34] : memref<10x10x4xf32, #tpu.memory_space<vmem>>, vector<8x8x4xf32>
    tpu.vector_store %arg14[%c1_32, %c1_33, %c0_34], %41 {strides = array<i32>} : memref<10x10x4xf32, #tpu.memory_space<vmem>>, vector<8x8x4xf32>,
    %c0_35 = arith.constant 0 : index
    %c0_36 = arith.constant 0 : index
    %43 = vector.load %arg8[%c0_35, %c0_36] : memref<1x4xf32, #tpu.memory_space<vmem>>, vector<1x4xf32>
    %cst_37 = arith.constant 0.000000e+00 : f32
    %44 = vector.broadcast %cst_37 : f32 to vector<64x4xf32>
    %c0_38 = arith.constant 0 : index
    %c0_39 = arith.constant 0 : index
    %c0_40 = arith.constant 0 : index
    %45 = vector.load %arg14[%c0_38, %c0_39, %c0_40] : memref<10x10x4xf32, #tpu.memory_space<vmem>>, vector<8x8x4xf32>
    %46 = vector.shape_cast %45 : vector<8x8x4xf32> to vector<64x4xf32>
    %c0_41 = arith.constant 0 : index
    %c0_42 = arith.constant 0 : index
    %c0_43 = arith.constant 0 : index
    %47 = vector.load %arg7[%c0_41, %c0_42, %c0_43] : memref<9x4x4xf32, #tpu.memory_space<vmem>>, vector<1x4x4xf32>
    %48 = vector.shape_cast %47 : vector<1x4x4xf32> to vector<4x4xf32>
    %cst_44 = arith.constant dense<0.000000e+00> : vector<64x4xf32>
    %49 = tpu.matmul %46, %48, %cst_44 {dimension_numbers = #tpu.dot_dimension_numbers<[1], [0], [0], [1], [0, 0, 1, 1], [], []>} : vector<64x4xf32>, vector<4x4xf32>, vector<64x4xf32> -> vector<64x4xf32>
    %50 = arith.addf %44, %49 : vector<64x4xf32>
    %c0_45 = arith.constant 0 : index
    %c1_46 = arith.constant 1 : index
    %c0_47 = arith.constant 0 : index
    %51 = vector.load %arg14[%c0_45, %c1_46, %c0_47] : memref<10x10x4xf32, #tpu.memory_space<vmem>>, vector<8x8x4xf32>
    %52 = vector.shape_cast %51 : vector<8x8x4xf32> to vector<64x4xf32>
    %c1_48 = arith.constant 1 : index
    %c0_49 = arith.constant 0 : index
    %c0_50 = arith.constant 0 : index
    %53 = vector.load %arg7[%c1_48, %c0_49, %c0_50] : memref<9x4x4xf32, #tpu.memory_space<vmem>>, vector<1x4x4xf32>
    %54 = vector.shape_cast %53 : vector<1x4x4xf32> to vector<4x4xf32>
    %cst_51 = arith.constant dense<0.000000e+00> : vector<64x4xf32>
    %55 = tpu.matmul %52, %54, %cst_51 {dimension_numbers = #tpu.dot_dimension_numbers<[1], [0], [0], [1], [0, 0, 1, 1], [], []>} : vector<64x4xf32>, vector<4x4xf32>, vector<64x4xf32> -> vector<64x4xf32>
    %56 = arith.addf %50, %55 : vector<64x4xf32>
    %c0_52 = arith.constant 0 : index
    %c2 = arith.constant 2 : index
    %c0_53 = arith.constant 0 : index
    %57 = vector.load %arg14[%c0_52, %c2, %c0_53] : memref<10x10x4xf32, #tpu.memory_space<vmem>>, vector<8x8x4xf32>
    %58 = vector.shape_cast %57 : vector<8x8x4xf32> to vector<64x4xf32>
    %c2_54 = arith.constant 2 : index
    %c0_55 = arith.constant 0 : index
    %c0_56 = arith.constant 0 : index
    %59 = vector.load %arg7[%c2_54, %c0_55, %c0_56] : memref<9x4x4xf32, #tpu.memory_space<vmem>>, vector<1x4x4xf32>
    %60 = vector.shape_cast %59 : vector<1x4x4xf32> to vector<4x4xf32>
    %cst_57 = arith.constant dense<0.000000e+00> : vector<64x4xf32>
    %61 = tpu.matmul %58, %60, %cst_57 {dimension_numbers = #tpu.dot_dimension_numbers<[1], [0], [0], [1], [0, 0, 1, 1], [], []>} : vector<64x4xf32>, vector<4x4xf32>, vector<64x4xf32> -> vector<64x4xf32>
    %62 = arith.addf %56, %61 : vector<64x4xf32>
    %c1_58 = arith.constant 1 : index
    %c0_59 = arith.constant 0 : index
    %c0_60 = arith.constant 0 : index
    %63 = vector.load %arg14[%c1_58, %c0_59, %c0_60] : memref<10x10x4xf32, #tpu.memory_space<vmem>>, vector<8x8x4xf32>
    %64 = vector.shape_cast %63 : vector<8x8x4xf32> to vector<64x4xf32>
    %c3 = arith.constant 3 : index
    %c0_61 = arith.constant 0 : index
    %c0_62 = arith.constant 0 : index
    %65 = vector.load %arg7[%c3, %c0_61, %c0_62] : memref<9x4x4xf32, #tpu.memory_space<vmem>>, vector<1x4x4xf32>
    %66 = vector.shape_cast %65 : vector<1x4x4xf32> to vector<4x4xf32>
    %cst_63 = arith.constant dense<0.000000e+00> : vector<64x4xf32>
    %67 = tpu.matmul %64, %66, %cst_63 {dimension_numbers = #tpu.dot_dimension_numbers<[1], [0], [0], [1], [0, 0, 1, 1], [], []>} : vector<64x4xf32>, vector<4x4xf32>, vector<64x4xf32> -> vector<64x4xf32>
    %68 = arith.addf %62, %67 : vector<64x4xf32>
    %c1_64 = arith.constant 1 : index
    %c1_65 = arith.constant 1 : index
    %c0_66 = arith.constant 0 : index
    %69 = vector.load %arg14[%c1_64, %c1_65, %c0_66] : memref<10x10x4xf32, #tpu.memory_space<vmem>>, vector<8x8x4xf32>
    %70 = vector.shape_cast %69 : vector<8x8x4xf32> to vector<64x4xf32>
    %c4 = arith.constant 4 : index
    %c0_67 = arith.constant 0 : index
    %c0_68 = arith.constant 0 : index
    %71 = vector.load %arg7[%c4, %c0_67, %c0_68] : memref<9x4x4xf32, #tpu.memory_space<vmem>>, vector<1x4x4xf32>
    %72 = vector.shape_cast %71 : vector<1x4x4xf32> to vector<4x4xf32>
    %cst_69 = arith.constant dense<0.000000e+00> : vector<64x4xf32>
    %73 = tpu.matmul %70, %72, %cst_69 {dimension_numbers = #tpu.dot_dimension_numbers<[1], [0], [0], [1], [0, 0, 1, 1], [], []>} : vector<64x4xf32>, vector<4x4xf32>, vector<64x4xf32> -> vector<64x4xf32>
    %74 = arith.addf %68, %73 : vector<64x4xf32>
    %c1_70 = arith.constant 1 : index
    %c2_71 = arith.constant 2 : index
    %c0_72 = arith.constant 0 : index
    %75 = vector.load %arg14[%c1_70, %c2_71, %c0_72] : memref<10x10x4xf32, #tpu.memory_space<vmem>>, vector<8x8x4xf32>
    %76 = vector.shape_cast %75 : vector<8x8x4xf32> to vector<64x4xf32>
    %c5 = arith.constant 5 : index
    %c0_73 = arith.constant 0 : index
    %c0_74 = arith.constant 0 : index
    %77 = vector.load %arg7[%c5, %c0_73, %c0_74] : memref<9x4x4xf32, #tpu.memory_space<vmem>>, vector<1x4x4xf32>
    %78 = vector.shape_cast %77 : vector<1x4x4xf32> to vector<4x4xf32>
    %cst_75 = arith.constant dense<0.000000e+00> : vector<64x4xf32>
    %79 = tpu.matmul %76, %78, %cst_75 {dimension_numbers = #tpu.dot_dimension_numbers<[1], [0], [0], [1], [0, 0, 1, 1], [], []>} : vector<64x4xf32>, vector<4x4xf32>, vector<64x4xf32> -> vector<64x4xf32>
    %80 = arith.addf %74, %79 : vector<64x4xf32>
    %c2_76 = arith.constant 2 : index
    %c0_77 = arith.constant 0 : index
    %c0_78 = arith.constant 0 : index
    %81 = vector.load %arg14[%c2_76, %c0_77, %c0_78] : memref<10x10x4xf32, #tpu.memory_space<vmem>>, vector<8x8x4xf32>
    %82 = vector.shape_cast %81 : vector<8x8x4xf32> to vector<64x4xf32>
    %c6 = arith.constant 6 : index
    %c0_79 = arith.constant 0 : index
    %c0_80 = arith.constant 0 : index
    %83 = vector.load %arg7[%c6, %c0_79, %c0_80] : memref<9x4x4xf32, #tpu.memory_space<vmem>>, vector<1x4x4xf32>
    %84 = vector.shape_cast %83 : vector<1x4x4xf32> to vector<4x4xf32>
    %cst_81 = arith.constant dense<0.000000e+00> : vector<64x4xf32>
    %85 = tpu.matmul %82, %84, %cst_81 {dimension_numbers = #tpu.dot_dimension_numbers<[1], [0], [0], [1], [0, 0, 1, 1], [], []>} : vector<64x4xf32>, vector<4x4xf32>, vector<64x4xf32> -> vector<64x4xf32>
    %86 = arith.addf %80, %85 : vector<64x4xf32>
    %c2_82 = arith.constant 2 : index
    %c1_83 = arith.constant 1 : index
    %c0_84 = arith.constant 0 : index
    %87 = vector.load %arg14[%c2_82, %c1_83, %c0_84] : memref<10x10x4xf32, #tpu.memory_space<vmem>>, vector<8x8x4xf32>
    %88 = vector.shape_cast %87 : vector<8x8x4xf32> to vector<64x4xf32>
    %c7 = arith.constant 7 : index
    %c0_85 = arith.constant 0 : index
    %c0_86 = arith.constant 0 : index
    %89 = vector.load %arg7[%c7, %c0_85, %c0_86] : memref<9x4x4xf32, #tpu.memory_space<vmem>>, vector<1x4x4xf32>
    %90 = vector.shape_cast %89 : vector<1x4x4xf32> to vector<4x4xf32>
    %cst_87 = arith.constant dense<0.000000e+00> : vector<64x4xf32>
    %91 = tpu.matmul %88, %90, %cst_87 {dimension_numbers = #tpu.dot_dimension_numbers<[1], [0], [0], [1], [0, 0, 1, 1], [], []>} : vector<64x4xf32>, vector<4x4xf32>, vector<64x4xf32> -> vector<64x4xf32>
    %92 = arith.addf %86, %91 : vector<64x4xf32>
    %c2_88 = arith.constant 2 : index
    %c2_89 = arith.constant 2 : index
    %c0_90 = arith.constant 0 : index
    %93 = vector.load %arg14[%c2_88, %c2_89, %c0_90] : memref<10x10x4xf32, #tpu.memory_space<vmem>>, vector<8x8x4xf32>
    %94 = vector.shape_cast %93 : vector<8x8x4xf32> to vector<64x4xf32>
    %c8 = arith.constant 8 : index
    %c0_91 = arith.constant 0 : index
    %c0_92 = arith.constant 0 : index
    %95 = vector.load %arg7[%c8, %c0_91, %c0_92] : memref<9x4x4xf32, #tpu.memory_space<vmem>>, vector<1x4x4xf32>
    %96 = vector.shape_cast %95 : vector<1x4x4xf32> to vector<4x4xf32>
    %cst_93 = arith.constant dense<0.000000e+00> : vector<64x4xf32>
    %97 = tpu.matmul %94, %96, %cst_93 {dimension_numbers = #tpu.dot_dimension_numbers<[1], [0], [0], [1], [0, 0, 1, 1], [], []>} : vector<64x4xf32>, vector<4x4xf32>, vector<64x4xf32> -> vector<64x4xf32>
    %98 = arith.addf %92, %97 : vector<64x4xf32>
    %99 = vector.broadcast %43 : vector<1x4xf32> to vector<64x4xf32>
    %100 = arith.addf %98, %99 : vector<64x4xf32>
    %cst_94 = arith.constant 0.000000e+00 : f32
    %101 = vector.broadcast %cst_94 : f32 to vector<64x4xf32>
    %102 = arith.maximumf %100, %101 : vector<64x4xf32>
    %c0_95 = arith.constant 0 : index
    %c0_96 = arith.constant 0 : index
    %103 = vector.load %arg9[%c0_95, %c0_96] : memref<4x8xf32, #tpu.memory_space<vmem>>, vector<4x8xf32>
    %cst_97 = arith.constant dense<0.000000e+00> : vector<64x8xf32>
    %104 = tpu.matmul %102, %103, %cst_97 {dimension_numbers = #tpu.dot_dimension_numbers<[1], [0], [0], [1], [0, 0, 1, 1], [], []>} : vector<64x4xf32>, vector<4x8xf32>, vector<64x8xf32> -> vector<64x8xf32>
    %c0_98 = arith.constant 0 : index
    %c0_99 = arith.constant 0 : index
    %105 = vector.load %arg10[%c0_98, %c0_99] : memref<1x8xf32, #tpu.memory_space<vmem>>, vector<1x8xf32>
    %106 = vector.broadcast %105 : vector<1x8xf32> to vector<64x8xf32>
    %107 = arith.addf %104, %106 : vector<64x8xf32>
    %cst_100 = arith.constant 0.000000e+00 : f32
    %108 = vector.broadcast %cst_100 : f32 to vector<64x8xf32>
    %109 = arith.maximumf %107, %108 : vector<64x8xf32>
    %c0_101 = arith.constant 0 : index
    %c0_102 = arith.constant 0 : index
    %110 = vector.load %arg11[%c0_101, %c0_102] : memref<4x8xf32, #tpu.memory_space<vmem>>, vector<4x8xf32>
    %cst_103 = arith.constant dense<0.000000e+00> : vector<64x8xf32>
    %111 = tpu.matmul %4, %110, %cst_103 {dimension_numbers = #tpu.dot_dimension_numbers<[1], [0], [0], [1], [0, 0, 1, 1], [], []>} : vector<64x4xf32>, vector<4x8xf32>, vector<64x8xf32> -> vector<64x8xf32>
    %c0_104 = arith.constant 0 : index
    %c0_105 = arith.constant 0 : index
    %112 = vector.load %arg12[%c0_104, %c0_105] : memref<1x8xf32, #tpu.memory_space<vmem>>, vector<1x8xf32>
    %113 = vector.broadcast %112 : vector<1x8xf32> to vector<64x8xf32>
    %114 = arith.addf %111, %113 : vector<64x8xf32>
    %115 = arith.addf %109, %114 : vector<64x8xf32>
    %116 = vector.shape_cast %115 : vector<64x8xf32> to vector<1x8x8x8xf32>
    %c0_106 = arith.constant 0 : index
    %c0_107 = arith.constant 0 : index
    %c0_108 = arith.constant 0 : index
    %c0_109 = arith.constant 0 : index
    %117 = vector.load %arg13[%c0_106, %c0_107, %c0_108, %c0_109] : memref<1x8x8x8xf32, #tpu.memory_space<vmem>>, vector<1x8x8x8xf32>
    tpu.vector_store %arg13[%c0_106, %c0_107, %c0_108, %c0_109], %116 {strides = array<i32>} : memref<1x8x8x8xf32, #tpu.memory_space<vmem>>, vector<1x8x8x8xf32>,
    return
  }
  func.func @transform_0(%arg0: i32, %arg1: i32) -> (i32, i32, i32, i32) {
    %c0_i32 = arith.constant 0 : i32
    %c0_i32_0 = arith.constant 0 : i32
    %c0_i32_1 = arith.constant 0 : i32
    return %arg0, %arg1, %c0_i32, %c0_i32_0 : i32, i32, i32, i32
  }
  func.func @transform_1(%arg0: i32, %arg1: i32) -> (i32, i32, i32, i32) {
    %c8_i32 = arith.constant 8 : i32
    %0 = arith.muli %arg1, %c8_i32 : i32
    %c1_i32 = arith.constant 1 : i32
    %1 = arith.subi %0, %c1_i32 : i32
    %c0_i32 = arith.constant 0 : i32
    %2 = arith.maxsi %1, %c0_i32 : i32
    %c0_i32_0 = arith.constant 0 : i32
    %c0_i32_1 = arith.constant 0 : i32
    %c0_i32_2 = arith.constant 0 : i32
    return %arg0, %2, %c0_i32_0, %c0_i32_1 : i32, i32, i32, i32
  }
  func.func @transform_2(%arg0: i32, %arg1: i32) -> (i32, i32, i32, i32) {
    %c8_i32 = arith.constant 8 : i32
    %0 = arith.muli %arg1, %c8_i32 : i32
    %c8_i32_0 = arith.constant 8 : i32
    %1 = arith.addi %0, %c8_i32_0 : i32
    %c7_i32 = arith.constant 7 : i32
    %2 = arith.minsi %1, %c7_i32 : i32
    %c0_i32 = arith.constant 0 : i32
    %c0_i32_1 = arith.constant 0 : i32
    %c0_i32_2 = arith.constant 0 : i32
    return %arg0, %2, %c0_i32, %c0_i32_1 : i32, i32, i32, i32
  }
  func.func @transform_3(%arg0: i32, %arg1: i32) -> (i32, i32) {
    %c0_i32 = arith.constant 0 : i32
    %c0_i32_0 = arith.constant 0 : i32
    %c0_i32_1 = arith.constant 0 : i32
    return %c0_i32, %c0_i32_0 : i32, i32
  }
  func.func @transform_4(%arg0: i32, %arg1: i32) -> (i32, i32) {
    %c0_i32 = arith.constant 0 : i32
    %c0_i32_0 = arith.constant 0 : i32
    %c0_i32_1 = arith.constant 0 : i32
    return %c0_i32, %c0_i32_0 : i32, i32
  }
  func.func @transform_5(%arg0: i32, %arg1: i32) -> (i32, i32, i32) {
    %c0_i32 = arith.constant 0 : i32
    %c0_i32_0 = arith.constant 0 : i32
    %c0_i32_1 = arith.constant 0 : i32
    %c0_i32_2 = arith.constant 0 : i32
    return %c0_i32, %c0_i32_0, %c0_i32_1 : i32, i32, i32
  }
  func.func @transform_6(%arg0: i32, %arg1: i32) -> (i32, i32) {
    %c0_i32 = arith.constant 0 : i32
    %c0_i32_0 = arith.constant 0 : i32
    %c0_i32_1 = arith.constant 0 : i32
    return %c0_i32, %c0_i32_0 : i32, i32
  }
  func.func @transform_7(%arg0: i32, %arg1: i32) -> (i32, i32) {
    %c0_i32 = arith.constant 0 : i32
    %c0_i32_0 = arith.constant 0 : i32
    %c0_i32_1 = arith.constant 0 : i32
    return %c0_i32, %c0_i32_0 : i32, i32
  }
  func.func @transform_8(%arg0: i32, %arg1: i32) -> (i32, i32) {
    %c0_i32 = arith.constant 0 : i32
    %c0_i32_0 = arith.constant 0 : i32
    %c0_i32_1 = arith.constant 0 : i32
    return %c0_i32, %c0_i32_0 : i32, i32
  }
  func.func @transform_9(%arg0: i32, %arg1: i32) -> (i32, i32) {
    %c0_i32 = arith.constant 0 : i32
    %c0_i32_0 = arith.constant 0 : i32
    %c0_i32_1 = arith.constant 0 : i32
    return %c0_i32, %c0_i32_0 : i32, i32
  }
  func.func @transform_10(%arg0: i32, %arg1: i32) -> (i32, i32) {
    %c0_i32 = arith.constant 0 : i32
    %c0_i32_0 = arith.constant 0 : i32
    %c0_i32_1 = arith.constant 0 : i32
    return %c0_i32, %c0_i32_0 : i32, i32
  }
  func.func @transform_11(%arg0: i32, %arg1: i32) -> (i32, i32, i32, i32) {
    %c0_i32 = arith.constant 0 : i32
    %c0_i32_0 = arith.constant 0 : i32
    %c0_i32_1 = arith.constant 0 : i32
    return %arg0, %arg1, %c0_i32, %c0_i32_0 : i32, i32, i32, i32
  }
}

</mosaic_0001>

<bundles_post_ra>
// kernel: tpu_custom_call.1
= control target key start
LH: loop header
LB: loop body
LE: loop exit
PB: predicated region body
PF: predicated region fallthrough
CT: control target
= control target key end

     0   :  { %s3756_s0 = inlined_call_operand.vmem [shape: f32[2,8,8,4], index: 0, kind: input, shape index: {}]   ;;  %s3757_s1 = inlined_call_operand.vmem [shape: f32[2,8,8,4], index: 1, kind: input, shape index: {}]   ;;  %s3758_s2 = inlined_call_operand.vmem [shape: f32[2,8,8,4], index: 2, kind: input, shape index: {}]   ;;  %s3759_s3 = inlined_call_operand.vmem [shape: f32[4,4], index: 3, kind: input, shape index: {}]   ;;  %s3760_s4 = inlined_call_operand.vmem [shape: f32[1,4], index: 4, kind: input, shape index: {}]   ;;  %s3761_s5 = inlined_call_operand.vmem [shape: f32[9,4,4], index: 5, kind: input, shape index: {}]   ;;  %s3762_s6 = inlined_call_operand.vmem [shape: f32[1,4], index: 6, kind: input, shape index: {}]   ;;  %s3763_s7 = inlined_call_operand.vmem [shape: f32[4,8], index: 7, kind: input, shape index: {}]   ;;  %s3764_s8 = inlined_call_operand.vmem [shape: f32[1,8], index: 8, kind: input, shape index: {}]   ;;  %s3765_s9 = inlined_call_operand.vmem [shape: f32[4,8], index: 9, kind: input, shape index: {}]   ;;  %s3766_s10 = inlined_call_operand.vmem [shape: f32[1,8], index: 10, kind: input, shape index: {}]   ;;  %s3767_s11 = inlined_call_operand.hbm [shape: f32[2,8,8,8], index: 11, kind: output, shape index: {}]  }
   0x1   :  { %3768 = sst [smem:[#allocation9_spill]] %s3756_s0 }
   0x2   :  { %3769 = sst [smem:[#allocation10_spill]] %s3757_s1 }
   0x3   :  { %16 = vsyncpa [#allocation4], 0 }
   0x4   :  { %18 = vsyncpa [#allocation4 + $0x1], 0  ;;  %s3293_s17 = smov 0   ;;  %s3295_s18 = smov 0  }
   0x5   :  { %s3297_s19 = smov 0   ;;  %s3299_s20 = smov 0  }
   0x6   :  { %s3301_s21 = smov 0   ;;  %s3303_s22 = smov 0  }
   0x7 LB: > { %s2654_s23 = sadd.s32 4294967295, %s3226_s22   ;;  %s2655_s24 = sadd.s32 4294967294, %s3226_s22   ;;  %s3226_s22 = sphi %s3303_s22, %s24_s22   ;;  %s3222_s21 = sphi %s3301_s21, %s3784_s21   ;;  %s3218_s20 = sphi %s3299_s20, %s3783_s20   ;;  %s3214_s19 = sphi %s3297_s19, %s3782_s19   ;;  %s3210_s18 = sphi %s3295_s18, %s3781_s18   ;;  %s3206_s17 = sphi %s3293_s17, %s3780_s17  }
   0x8   : > { %s36_s25 = sadd.s32 1, %s3222_s21  ;;  %s313_s26 = sadd.s32 1, %s3214_s19 }
   0x9   : > { %p38_p0 = scmp.ge.s32.totalorder %s36_s25, 2  ;;  %p323_p1 = scmp.ne.s32.totalorder %s3214_s19, %s3210_s18 }
   0xa   : > { %p324_p2 = scmp.eq.s32.totalorder %s2654_s23, 1  ;;  %p329_p3 = scmp.ne.s32.totalorder %s3210_s18, %s3206_s17 }
   0xb   : > { %s3786_s25 = smov (%p38_p0, %s36_s25), 0  ;;  %p330_p5 = scmp.eq.s32.totalorder %s2655_s24, 1 }
   0xc   : > { %p3333_p4 = por %p324_p2, %p323_p1  ;;  %s308_s28 = ssub.s32 %s3222_s21, %s3786_s25 }
   0xd   : > { %p2658_p6 = scmp.ge.s32.totalorder %s3226_s22, 1  ;;  %p311_p7 = scmp.eq.s32.totalorder %s308_s28, 0 }
   0xe   : > { %p3340_p8 = por %p330_p5, %p329_p3  ;;  %p423_p9 = scmp.lt.s32.totalorder %s3226_s22, 3 }
   0xf   : > { %s3346_s30 = scalar_select %p311_p7, %s3214_s19, %s313_s26  }
  0x10   : > { %p424_p10 = pnand %p2658_p6, %p423_p9 }
  0x12   : > { %427 = sbr.rel (%p424_p10) target bundleno = 750 (0x2ee), region = 64 }
  0x17   : > { %v534_v0 = vld [vmem:[%s3759_s3] sm:$0xf]  ;;  %vm575_vm0 = vcmask 1043456   ;;  %p492_p11 = scmp.lt.s32.totalorder %s3218_s20, 1  ;;  %v3228_v1 = vmov 0.0   ;;  %vm3229_vm1 = vmmov 0  }
  0x18   : > { %2913 = vmatprep.subr.msk.mxu0 %vm575_vm0, %v534_v0  ;;  %2932 = vmatprep.subr.mxu1 %v3228_v1  ;;  %vm550_vm2 = vcmask 31744   ;;  %s3772_s0 = sld [smem:[#allocation9_spill]]  ;;  %vm852_vm3 = vcmask 24576   ;;  %v2680_v12 = vld [vmem:[%s3761_s5 + $0x4] sm:$0xf]  ;;  %vm2514_vm4 = vcmask 64512  }
  0x19   : > { %2914 = vmatpush3.msk.msra.mxu0 %vm575_vm0, %v534_v0  ;;  %s493_s14 = scalar_select %p492_p11, %s3218_s20, 1  ;;  %2933 = vmatpush3.msk.msra.mxu1 %vm575_vm0, %v534_v0  ;;  %853 = vst.msk [vmem:[#allocation2] sm:$0x1] %vm852_vm3, %v3228_v1  ;;  %854 = vst.msk [vmem:[#allocation2 + $0x10] sm:$0x1] %vm852_vm3, %v3228_v1 }
  0x1a   : > { %2927 = vmatprep.subr.mxu0 %v3228_v1  ;;  %2934 = vmatprep.mubr.msk.f32.mxu1 %vm3229_vm1, %v3228_v1  ;;  %s3773_s1 = sld [smem:[#allocation10_spill]]  ;;  %855 = vst.msk [vmem:[#allocation2 + $0x20] sm:$0x1] %vm852_vm3, %v3228_v1  ;;  %856 = vst.msk [vmem:[#allocation2 + $0x30] sm:$0x1] %vm852_vm3, %v3228_v1 }
  0x1b   : > { %s2795_s15 = sshll.u32 %s493_s14, 6  ;;  %857 = vst.msk [vmem:[#allocation2 + $0x40] sm:$0x1] %vm852_vm3, %v3228_v1  ;;  %858 = vst.msk [vmem:[#allocation2 + $0x50] sm:$0x1] %vm852_vm3, %v3228_v1  ;;  %2937 = vmatprep.subr.msk.mxu1 %vm575_vm0, %v2680_v12  ;;  %s2799_s14 = sshll.u32 %s3218_s20, 10 }
  0x1c   : > { %s2798_s26 = sadd.s32 56, %s2795_s15  ;;  %859 = vst.msk [vmem:[#allocation2 + $0x60] sm:$0x1] %vm852_vm3, %v3228_v1  ;;  %860 = vst.msk [vmem:[#allocation2 + $0x70] sm:$0x1] %vm852_vm3, %v3228_v1 }
  0x1d   : > { %s528_s13 = scalar_lea.vmem %s3758_s2, %s2798_s26  ;;  %861 = vst.msk [vmem:[#allocation2 + $0x80] sm:$0x1] %vm852_vm3, %v3228_v1  ;;  %862 = vst.msk [vmem:[#allocation2 + $0x90] sm:$0x1] %vm852_vm3, %v3228_v1  ;;  %v894_v13 = vld [vmem:[%s3761_s5] sm:$0xf]  ;;  %s3701_s26 = scalar_lea.hbm %s3767_s11, %s2799_s14 }
  0x1e   : > { %s499_s24 = scalar_lea.vmem %s3772_s0, %s2795_s15  ;;  %v767_v6 = vld [vmem:[%s528_s13] sm:$0xff]  ;;  %863 = vst.msk [vmem:[#allocation2 + $0x9] sm:$0x1] %vm852_vm3, %v3228_v1  ;;  %864 = vst.msk [vmem:[#allocation2 + $0x19] sm:$0x1] %vm852_vm3, %v3228_v1 }
  0x1f   : > { %v3360_v2 = vld [vmem:[%s499_s24] sm:$0xff]  ;;  %v3362_v3 = vld [vmem:[%s499_s24 + $0x8] sm:$0xff]  ;;  %v3364_v4 = vld [vmem:[%s499_s24 + $0x10] sm:$0xff]  ;;  %2935 = vmatmul.mubr.msk.f32.vlgmr.msra.gmra.mxu1 %vm550_vm2, %v767_v6  ;;  %865 = vst.msk [vmem:[#allocation2 + $0x29] sm:$0x1] %vm852_vm3, %v3228_v1 }
  0x20   : > { %2915 = vmatprep.mubr.msk.f32.mxu0 %vm550_vm2, %v3360_v2  ;;  %v3376_v5 = vld [vmem:[%s499_s24 + $0x18] sm:$0xff]  ;;  %v3378_v7 = vld [vmem:[%s499_s24 + $0x20] sm:$0xff]  ;;  %v3385_v8 = vld [vmem:[%s499_s24 + $0x28] sm:$0xff]  ;;  %s512_s23 = scalar_lea.vmem %s3773_s1, %s2795_s15  ;;  %866 = vst.msk [vmem:[#allocation2 + $0x39] sm:$0x1] %vm852_vm3, %v3228_v1  ;;  %2938 = vmatpush3.msk.msra.mxu1 %vm575_vm0, %v2680_v12 }
  0x21   : > { %2916 = vmatmul.mubr.msk.f32.vlgmr.msra.gmra.mxu0 %vm550_vm2, %v3362_v3  ;;  %v3387_v9 = vld [vmem:[%s499_s24 + $0x30] sm:$0xff]  ;;  %v3393_v10 = vld [vmem:[%s499_s24 + $0x38] sm:$0xff]  ;;  %v692_v11 = vld [vmem:[%s512_s23] sm:$0xff]  ;;  %867 = vst.msk [vmem:[#allocation2 + $0x49] sm:$0x1] %vm852_vm3, %v3228_v1  ;;  %s488_s24 = sand.u32 1, %s3210_s18  }
  0x22   : > { %2928 = vmatpush3.msk.msra.mxu0 %vm575_vm0, %v534_v0  ;;  %2918 = vmatprep.mubr.msk.f32.mxu0 %vm550_vm2, %v3364_v4  ;;  %868 = vst.msk [vmem:[#allocation2 + $0x59] sm:$0x1] %vm852_vm3, %v3228_v1  ;;  %869 = vst.msk [vmem:[#allocation2 + $0x69] sm:$0x1] %vm852_vm3, %v3228_v1  ;;  %v2699_v14 = vld [vmem:[%s3761_s5 + $0x8] sm:$0xf] }
  0x23   : > { %870 = vst.msk [vmem:[#allocation2 + $0x79] sm:$0x1] %vm852_vm3, %v3228_v1  ;;  %871 = vst.msk [vmem:[#allocation2 + $0x89] sm:$0x1] %vm852_vm3, %v3228_v1  ;;  %2951 = vmatprep.subr.msk.mxu0 %vm575_vm0, %v894_v13  ;;  %2965 = vmatprep.subr.msk.mxu1 %vm575_vm0, %v2699_v14  ;;  %v2709_v15 = vld [vmem:[%s3761_s5 + $0xc] sm:$0xf] }
  0x24   : > { %872 = vst.msk [vmem:[#allocation2 + $0x99] sm:$0x1] %vm852_vm3, %v3228_v1  ;;  %v2666_v16 = vld [vmem:[%s3760_s4] ss:$0 sm:$0xff]  ;;  %v2719_v56 = vld [vmem:[%s3761_s5 + $0x10] sm:$0xf] }
  0x25   : > { %2919 = vmatmul.mubr.msk.f32.gmra.mxu0 %vm550_vm2, %v3376_v5  ;;  %v2729_v57 = vld [vmem:[%s3761_s5 + $0x14] sm:$0xf]  ;;  %s2659_s12 = sshll.u32 %s488_s24, 6  ;;  %s3711_s20 = scalar_lea.sflag [#allocation4], %s488_s24 }
  0x26   : > { %2921 = vmatprep.mubr.msk.f32.mxu0 %vm550_vm2, %v3378_v7  ;;  %s3682_s13 = scalar_lea.vmem [#allocation3], %s2659_s12  ;;  %s3230_s12 = smov [#allocation3]  }
  0x27   : > { %s2539_s16 = sshll.u32 %s3682_s13, 4  ;;  %s3154_s14 = sshll.u32 %s3230_s12, 4  ;;  %s3703_s16 = int_to_ptr.vmem [resolvable:$true] %s2539_s16  ;;  %s3155_s14 = int_to_ptr.vmem [resolvable:$false] %s3154_s14 }
  0x28   : > { %s3150_s28 = scalar_lea.vmem %s3703_s16, 1024  ;;  %s3156_s23 = scalar_lea.vmem %s3155_s14, 2048 }
  0x29   : > { %2922 = vmatmul.mubr.msk.f32.gmra.mxu0 %vm550_vm2, %v3385_v8  ;;  %p3151_p12 = scmp.ne.s32.totalorder %s3703_s16, %s3150_s28  ;;  %p3157_p1 = scmp.lt.s32.totalorder %s3703_s16, %s3155_s14 }
  0x2a   : > { %2924 = vmatprep.mubr.msk.f32.mxu0 %vm550_vm2, %v3387_v9  ;;  %p3158_p2 = scmp.lt.s32.totalorder %s3156_s23, %s3150_s28 }
  0x2b   : > { %p3152_p13 = pnand %p3151_p12, %p3333_p4 }
  0x2c   : > { %p3159_p3 = por %p3158_p2, %p3157_p1 }
  0x2d   : > { %2925 = vmatmul.mubr.msk.f32.gmra.mxu0 %vm550_vm2, %v3393_v10  ;;  %p3153_p0 = pneg %p3152_p13 }
  0x2e   : > { %2929 = vmatprep.mubr.msk.f32.mxu0 %vm3229_vm1, %v3228_v1 }
  0x2f   : > { %p3160_p5 = pnand %p3159_p3, %p3153_p0 }
  0x31   : > { %2930 = vmatmul.mubr.msk.f32.vlgmr.msra.gmra.mxu0 %vm550_vm2, %v692_v11 }
  0x32   : > { %2952 = vmatpush3.msk.msra.mxu0 %vm575_vm0, %v894_v13 }
  0x33   : > { %2979 = vmatprep.subr.msk.mxu0 %vm575_vm0, %v2709_v15 }
  0xdf   : > { %v837_v20 = vpop.f32.mrf.mxu1 }
  0xe0   : > { %v838_v23 = vadd.f32 %v2666_v16, %v837_v20 }
  0xe1   : > { %v2917_v17 = vpop.f32.mrf.mxu0  ;;  %v2936_v25 = vpop.f32.mrf.mxu1 }
  0xe2   : > { %v651_v18 = vadd.f32 %v2917_v17, %v2666_v16  ;;  %v841_v28 = vmax.f32 %v838_v23, 0.0  ;;  %v2749_v17 = vld [vmem:[%s3761_s5 + $0x1c] sm:$0xf] }
  0xe3   : > { %v645_v19 = vpop.f32.mrf.mxu0 }
  0xe4   : > { %v685_v21 = vmax.f32 %v651_v18, 0.0  ;;  %v646_v22 = vadd.f32 %v2666_v16, %v645_v19  ;;  %v851_v32 = vmul.f32 0.0, %v841_v28 }
  0xe5   : > { %v2920_v24 = vpop.f32.mrf.mxu0 }
  0xe6   : > { %878 = vst.msk [vmem:[#allocation2 + $0x21] sm:$0xff] %vm550_vm2, %v685_v21  ;;  %v684_v26 = vmax.f32 %v646_v22, 0.0  ;;  %v661_v27 = vadd.f32 %v2920_v24, %v2666_v16  ;;  %875 = vst.msk [vmem:[#allocation2 + $0x91] sm:$0xff] %vm550_vm2, %v851_v32  ;;  %v2759_v24 = vld [vmem:[%s3761_s5 + $0x20] sm:$0xf] }
  0xe7   : > { %v655_v29 = vpop.f32.mrf.mxu0 }
  0xe8   : > { %877 = vst.msk [vmem:[#allocation2 + $0x11] sm:$0xff] %vm550_vm2, %v684_v26  ;;  %v687_v30 = vmax.f32 %v661_v27, 0.0  ;;  %v656_v31 = vadd.f32 %v2666_v16, %v655_v29 }
  0xe9   : > { %v2923_v33 = vpop.f32.mrf.mxu0 }
  0xea   : > { %880 = vst.msk [vmem:[#allocation2 + $0x41] sm:$0xff] %vm550_vm2, %v687_v30  ;;  %v686_v34 = vmax.f32 %v656_v31, 0.0  ;;  %v671_v35 = vadd.f32 %v2923_v33, %v2666_v16  ;;  %v2242_v30 = vld [vmem:[%s3763_s7] sm:$0xf] }
  0xeb   : > { %v665_v36 = vpop.f32.mrf.mxu0  ;;  %v2390_v31 = vld [vmem:[%s3765_s9] sm:$0xf] }
  0xec   : > { %879 = vst.msk [vmem:[#allocation2 + $0x31] sm:$0xff] %vm550_vm2, %v686_v34  ;;  %v689_v37 = vmax.f32 %v671_v35, 0.0  ;;  %v666_v38 = vadd.f32 %v2666_v16, %v665_v36 }
  0xed   : > { %v2926_v39 = vpop.f32.mrf.mxu0  ;;  %v3460_v55 = vld [vmem:[#allocation2 + $0x21] sm:$0xff]  ;;  %v1777_v27 = vld [vmem:[#allocation2 + $0x90] sm:$0xff] }
  0xee   : > { %882 = vst.msk [vmem:[#allocation2 + $0x61] sm:$0xff] %vm550_vm2, %v689_v37  ;;  %v688_v40 = vmax.f32 %v666_v38, 0.0  ;;  %v681_v41 = vadd.f32 %v2926_v39, %v2666_v16  ;;  %v3471_v58 = vld [vmem:[#allocation2 + $0x20] sm:$0xff]  ;;  %v1927_v28 = vld [vmem:[#allocation2 + $0x91] sm:$0xff] }
  0xef   : > { %v675_v42 = vpop.f32.mrf.mxu0  ;;  %v3455_v53 = vld [vmem:[#allocation2 + $0x11] sm:$0xff] }
  0xf0   : > { %881 = vst.msk [vmem:[#allocation2 + $0x51] sm:$0xff] %vm550_vm2, %v688_v40  ;;  %v691_v43 = vmax.f32 %v681_v41, 0.0  ;;  %v676_v44 = vadd.f32 %v2666_v16, %v675_v42  ;;  %v887_v54 = vld [vmem:[#allocation2 + $0x10] sm:$0xff] }
  0xf1   : > { %v762_v45 = vpop.f32.mrf.mxu0  ;;  %v3486_v61 = vld [vmem:[#allocation2 + $0x41] sm:$0xff]  ;;  %v2077_v29 = vld [vmem:[#allocation2 + $0x92] sm:$0xff] }
  0xf2   : > { %884 = vst.msk [vmem:[#allocation2 + $0x81] sm:$0xff] %vm550_vm2, %v691_v43  ;;  %v690_v46 = vmax.f32 %v676_v44, 0.0  ;;  %v763_v47 = vadd.f32 %v2666_v16, %v762_v45  ;;  %v3488_v62 = vld [vmem:[#allocation2 + $0x40] sm:$0xff]  ;;  %v2739_v16 = vld [vmem:[%s3761_s5 + $0x18] sm:$0xf] }
  0xf3   : > { %v2931_v48 = vpop.f32.mrf.mxu0  ;;  %v3476_v59 = vld [vmem:[#allocation2 + $0x31] sm:$0xff]  ;;  %v1173_v19 = vld [vmem:[#allocation2 + $0x42] sm:$0xff] }
  0xf4   : > { %883 = vst.msk [vmem:[#allocation2 + $0x71] sm:$0xff] %vm550_vm2, %v690_v46  ;;  %v766_v49 = vmax.f32 %v763_v47, 0.0  ;;  %v3478_v60 = vld [vmem:[#allocation2 + $0x30] sm:$0xff] }
  0xf5   : > { %v3502_v1 = vld [vmem:[#allocation2 + $0x61] sm:$0xff]  ;;  %v1172_v18 = vld [vmem:[#allocation2 + $0x32] sm:$0xff] }
  0xf6   : > { %v846_v50 = vmul.f32 0.0, %v766_v49  ;;  %v3504_v6 = vld [vmem:[#allocation2 + $0x60] sm:$0xff] }
  0xf7   : > { %v3494_v63 = vld [vmem:[#allocation2 + $0x51] sm:$0xff]  ;;  %v1175_v21 = vld [vmem:[#allocation2 + $0x62] sm:$0xff] }
  0xf8   : > { %873 = vst.msk [vmem:[#allocation2 + $0x1] sm:$0xff] %vm550_vm2, %v846_v50  ;;  %v3496_v0 = vld [vmem:[#allocation2 + $0x50] sm:$0xff] }
  0xf9   : > { %v1174_v20 = vld [vmem:[#allocation2 + $0x52] sm:$0xff]  ;;  %v1326_v23 = vld [vmem:[#allocation2 + $0x80] sm:$0xff] }
  0xfa   : > { %v1476_v25 = vld [vmem:[#allocation2 + $0x81] sm:$0xff] }
  0xfb   : > { %v3510_v11 = vld [vmem:[#allocation2 + $0x71] sm:$0xff]  ;;  %v1626_v26 = vld [vmem:[#allocation2 + $0x82] sm:$0xff] }
  0xfc   : > { %v3512_v12 = vld [vmem:[#allocation2 + $0x70] sm:$0xff] }
  0xfd   : > { %v1176_v22 = vld [vmem:[#allocation2 + $0x72] sm:$0xff] }
  0xff   : > { %v895_v51 = vld [vmem:[#allocation2 + $0x1] sm:$0xff] }
 0x100   : > { %v886_v52 = vld [vmem:[#allocation2] sm:$0xff]  ;;  %2939 = vmatprep.mubr.msk.f32.mxu1 %vm550_vm2, %v895_v51 }
 0x101   : > { %2953 = vmatprep.mubr.msk.f32.mxu0 %vm550_vm2, %v886_v52  ;;  %2940 = vmatmul.mubr.msk.f32.vlgmr.msra.gmra.mxu1 %vm550_vm2, %v3455_v53  ;;  %v1169_v13 = vld [vmem:[#allocation2 + $0x2] sm:$0xff] }
 0x102   : > { %2954 = vmatmul.mubr.msk.f32.vlgmr.msra.gmra.mxu0 %vm550_vm2, %v887_v54  ;;  %2966 = vmatpush3.msk.msra.mxu1 %vm575_vm0, %v2699_v14  ;;  %v1170_v14 = vld [vmem:[#allocation2 + $0x12] sm:$0xff] }
 0x103   : > { %2942 = vmatprep.mubr.msk.f32.mxu1 %vm550_vm2, %v3460_v55  ;;  %2956 = vmatprep.mubr.msk.f32.mxu0 %vm550_vm2, %v3471_v58 }
 0x104   : > { %2980 = vmatpush3.msk.msra.mxu0 %vm575_vm0, %v2709_v15  ;;  %2993 = vmatprep.subr.msk.mxu1 %vm575_vm0, %v2719_v56  ;;  %v3523_v15 = vld [vmem:[#allocation2 + $0x22] sm:$0xff] }
 0x105   : > { %3007 = vmatprep.subr.msk.mxu0 %vm575_vm0, %v2729_v57  ;;  %2943 = vmatmul.mubr.msk.f32.gmra.mxu1 %vm550_vm2, %v3476_v59 }
 0x106   : > { %2957 = vmatmul.mubr.msk.f32.gmra.mxu0 %vm550_vm2, %v3478_v60  ;;  %2945 = vmatprep.mubr.msk.f32.mxu1 %vm550_vm2, %v3486_v61 }
 0x107   : > { %2959 = vmatprep.mubr.msk.f32.mxu0 %vm550_vm2, %v3488_v62 }
 0x109   : > { %2946 = vmatmul.mubr.msk.f32.gmra.mxu1 %vm550_vm2, %v3494_v63 }
 0x10a   : > { %2960 = vmatmul.mubr.msk.f32.gmra.mxu0 %vm550_vm2, %v3496_v0  ;;  %2948 = vmatprep.mubr.msk.f32.mxu1 %vm550_vm2, %v3502_v1 }
 0x10b   : > { %2962 = vmatprep.mubr.msk.f32.mxu0 %vm550_vm2, %v3504_v6 }
 0x10d   : > { %2949 = vmatmul.mubr.msk.f32.gmra.mxu1 %vm550_vm2, %v3510_v11 }
 0x10e   : > { %2963 = vmatmul.mubr.msk.f32.gmra.mxu0 %vm550_vm2, %v3512_v12  ;;  %2967 = vmatprep.mubr.msk.f32.mxu1 %vm550_vm2, %v1169_v13 }
 0x10f   : > { %2981 = vmatprep.mubr.msk.f32.mxu0 %vm550_vm2, %v887_v54 }
 0x111   : > { %2968 = vmatmul.mubr.msk.f32.vlgmr.msra.gmra.mxu1 %vm550_vm2, %v1170_v14 }
 0x112   : > { %2982 = vmatmul.mubr.msk.f32.vlgmr.msra.gmra.mxu0 %vm550_vm2, %v3471_v58  ;;  %2994 = vmatpush3.msk.msra.mxu1 %vm575_vm0, %v2719_v56 }
 0x113   : > { %2970 = vmatprep.mubr.msk.f32.mxu1 %vm550_vm2, %v3523_v15  ;;  %2984 = vmatprep.mubr.msk.f32.mxu0 %vm550_vm2, %v3478_v60 }
 0x114   : > { %3008 = vmatpush3.msk.msra.mxu0 %vm575_vm0, %v2729_v57  ;;  %3021 = vmatprep.subr.msk.mxu1 %vm575_vm0, %v2739_v16 }
 0x115   : > { %3035 = vmatprep.subr.msk.mxu0 %vm575_vm0, %v2749_v17  ;;  %2971 = vmatmul.mubr.msk.f32.gmra.mxu1 %vm550_vm2, %v1172_v18 }
 0x116   : > { %2985 = vmatmul.mubr.msk.f32.gmra.mxu0 %vm550_vm2, %v3488_v62  ;;  %2973 = vmatprep.mubr.msk.f32.mxu1 %vm550_vm2, %v1173_v19 }
 0x117   : > { %2987 = vmatprep.mubr.msk.f32.mxu0 %vm550_vm2, %v3496_v0 }
 0x119   : > { %2974 = vmatmul.mubr.msk.f32.gmra.mxu1 %vm550_vm2, %v1174_v20 }
 0x11a   : > { %2988 = vmatmul.mubr.msk.f32.gmra.mxu0 %vm550_vm2, %v3504_v6  ;;  %2976 = vmatprep.mubr.msk.f32.mxu1 %vm550_vm2, %v1175_v21 }
 0x11b   : > { %2990 = vmatprep.mubr.msk.f32.mxu0 %vm550_vm2, %v3512_v12 }
 0x11d   : > { %2977 = vmatmul.mubr.msk.f32.gmra.mxu1 %vm550_vm2, %v1176_v22 }
 0x11e   : > { %2991 = vmatmul.mubr.msk.f32.gmra.mxu0 %vm550_vm2, %v1326_v23  ;;  %2995 = vmatprep.mubr.msk.f32.mxu1 %vm550_vm2, %v3455_v53 }
 0x11f   : > { %3009 = vmatprep.mubr.msk.f32.mxu0 %vm550_vm2, %v1170_v14 }
 0x121   : > { %2996 = vmatmul.mubr.msk.f32.vlgmr.msra.gmra.mxu1 %vm550_vm2, %v3460_v55 }
 0x122   : > { %3010 = vmatmul.mubr.msk.f32.vlgmr.msra.gmra.mxu0 %vm550_vm2, %v3523_v15  ;;  %3022 = vmatpush3.msk.msra.mxu1 %vm575_vm0, %v2739_v16 }
 0x123   : > { %2998 = vmatprep.mubr.msk.f32.mxu1 %vm550_vm2, %v3476_v59  ;;  %3012 = vmatprep.mubr.msk.f32.mxu0 %vm550_vm2, %v1172_v18 }
 0x124   : > { %3036 = vmatpush3.msk.msra.mxu0 %vm575_vm0, %v2749_v17  ;;  %3049 = vmatprep.subr.msk.mxu1 %vm575_vm0, %v2759_v24 }
 0x125   : > { %2999 = vmatmul.mubr.msk.f32.gmra.mxu1 %vm550_vm2, %v3486_v61  ;;  %3063 = vmatprep.subr.msk.mxu0 %vm575_vm0, %v2242_v30 }
 0x126   : > { %3013 = vmatmul.mubr.msk.f32.gmra.mxu0 %vm550_vm2, %v1173_v19  ;;  %3001 = vmatprep.mubr.msk.f32.mxu1 %vm550_vm2, %v3494_v63 }
 0x127   : > { %3015 = vmatprep.mubr.msk.f32.mxu0 %vm550_vm2, %v1174_v20 }
 0x129   : > { %3002 = vmatmul.mubr.msk.f32.gmra.mxu1 %vm550_vm2, %v3502_v1 }
 0x12a   : > { %3016 = vmatmul.mubr.msk.f32.gmra.mxu0 %vm550_vm2, %v1175_v21  ;;  %3004 = vmatprep.mubr.msk.f32.mxu1 %vm550_vm2, %v3510_v11 }
 0x12b   : > { %3018 = vmatprep.mubr.msk.f32.mxu0 %vm550_vm2, %v1176_v22 }
 0x12d   : > { %3005 = vmatmul.mubr.msk.f32.gmra.mxu1 %vm550_vm2, %v1476_v25 }
 0x12e   : > { %3019 = vmatmul.mubr.msk.f32.gmra.mxu0 %vm550_vm2, %v1626_v26  ;;  %3023 = vmatprep.mubr.msk.f32.mxu1 %vm550_vm2, %v3471_v58 }
 0x12f   : > { %3037 = vmatprep.mubr.msk.f32.mxu0 %vm550_vm2, %v3460_v55 }
 0x131   : > { %3024 = vmatmul.mubr.msk.f32.vlgmr.msra.gmra.mxu1 %vm550_vm2, %v3478_v60 }
 0x132   : > { %3038 = vmatmul.mubr.msk.f32.vlgmr.msra.gmra.mxu0 %vm550_vm2, %v3476_v59  ;;  %3050 = vmatpush3.msk.msra.mxu1 %vm575_vm0, %v2759_v24 }
 0x133   : > { %3026 = vmatprep.mubr.msk.f32.mxu1 %vm550_vm2, %v3488_v62  ;;  %3040 = vmatprep.mubr.msk.f32.mxu0 %vm550_vm2, %v3486_v61 }
 0x134   : > { %3064 = vmatpush3.msk.msra.mxu0 %vm575_vm0, %v2242_v30  ;;  %3077 = vmatprep.subr.msk.mxu1 %vm575_vm0, %v2390_v31 }
 0x135   : > { %3027 = vmatmul.mubr.msk.f32.gmra.mxu1 %vm550_vm2, %v3496_v0 }
 0x136   : > { %3041 = vmatmul.mubr.msk.f32.gmra.mxu0 %vm550_vm2, %v3494_v63  ;;  %3029 = vmatprep.mubr.msk.f32.mxu1 %vm550_vm2, %v3504_v6 }
 0x137   : > { %3043 = vmatprep.mubr.msk.f32.mxu0 %vm550_vm2, %v3502_v1 }
 0x139   : > { %3030 = vmatmul.mubr.msk.f32.gmra.mxu1 %vm550_vm2, %v3512_v12 }
 0x13a   : > { %3044 = vmatmul.mubr.msk.f32.gmra.mxu0 %vm550_vm2, %v3510_v11  ;;  %3032 = vmatprep.mubr.msk.f32.mxu1 %vm550_vm2, %v1326_v23 }
 0x13b   : > { %3046 = vmatprep.mubr.msk.f32.mxu0 %vm550_vm2, %v1476_v25 }
 0x13d   : > { %3033 = vmatmul.mubr.msk.f32.gmra.mxu1 %vm550_vm2, %v1777_v27 }
 0x13e   : > { %3047 = vmatmul.mubr.msk.f32.gmra.mxu0 %vm550_vm2, %v1927_v28  ;;  %3051 = vmatprep.mubr.msk.f32.mxu1 %vm550_vm2, %v3523_v15 }
 0x141   : > { %3052 = vmatmul.mubr.msk.f32.vlgmr.msra.gmra.mxu1 %vm550_vm2, %v1172_v18 }
 0x142   : > { %3054 = vmatprep.mubr.msk.f32.mxu1 %vm550_vm2, %v1173_v19  ;;  %3078 = vmatpush3.msk.msra.mxu1 %vm575_vm0, %v2390_v31 }
 0x145   : > { %3055 = vmatmul.mubr.msk.f32.gmra.mxu1 %vm550_vm2, %v1174_v20 }
 0x146   : > { %3057 = vmatprep.mubr.msk.f32.mxu1 %vm550_vm2, %v1175_v21 }
 0x149   : > { %3058 = vmatmul.mubr.msk.f32.gmra.mxu1 %vm550_vm2, %v1176_v22 }
 0x14a   : > { %3060 = vmatprep.mubr.msk.f32.mxu1 %vm550_vm2, %v1626_v26 }
 0x14d   : > { %3061 = vmatmul.mubr.msk.f32.gmra.mxu1 %vm550_vm2, %v2077_v29 }
 0x14e   : > { %3079 = vmatprep.mubr.msk.f32.mxu1 %vm550_vm2, %v3360_v2 }
 0x151   : > { %3080 = vmatmul.mubr.msk.f32.vlgmr.msra.gmra.mxu1 %vm550_vm2, %v3362_v3 }
 0x152   : > { %3082 = vmatprep.mubr.msk.f32.mxu1 %vm550_vm2, %v3364_v4 }
 0x155   : > { %3083 = vmatmul.mubr.msk.f32.gmra.mxu1 %vm550_vm2, %v3376_v5 }
 0x156   : > { %3085 = vmatprep.mubr.msk.f32.mxu1 %vm550_vm2, %v3378_v7 }
 0x159   : > { %3086 = vmatmul.mubr.msk.f32.gmra.mxu1 %vm550_vm2, %v3385_v8 }
 0x15a   : > { %3088 = vmatprep.mubr.msk.f32.mxu1 %vm550_vm2, %v3387_v9 }
 0x15d   : > { %3089 = vmatmul.mubr.msk.f32.gmra.mxu1 %vm550_vm2, %v3393_v10 }
 0x1c1   : > { %v2941_v2 = vpop.f32.mrf.mxu1 }
 0x1c2   : > { %v2955_v3 = vpop.f32.mrf.mxu0 }
 0x1c3   : > { %v998_v32 = vpop.f32.mrf.mxu1  ;;  %v1136_v14 = vadd.f32 %v2955_v3, %v2941_v2 }
 0x1c4   : > { %v1130_v33 = vpop.f32.mrf.mxu0 }
 0x1c5   : > { %v2944_v4 = vpop.f32.mrf.mxu1  ;;  %v1131_v17 = vadd.f32 %v1130_v33, %v998_v32 }
 0x1c6   : > { %v2958_v34 = vpop.f32.mrf.mxu0 }
 0x1c7   : > { %v1008_v35 = vpop.f32.mrf.mxu1  ;;  %v1146_v21 = vadd.f32 %v2958_v34, %v2944_v4 }
 0x1c8   : > { %v1140_v5 = vpop.f32.mrf.mxu0 }
 0x1c9   : > { %v2947_v36 = vpop.f32.mrf.mxu1  ;;  %v1141_v24 = vadd.f32 %v1140_v5, %v1008_v35 }
 0x1ca   : > { %v2961_v37 = vpop.f32.mrf.mxu0 }
 0x1cb   : > { %v1018_v7 = vpop.f32.mrf.mxu1  ;;  %v1156_v29 = vadd.f32 %v2961_v37, %v2947_v36 }
 0x1cc   : > { %v1150_v38 = vpop.f32.mrf.mxu0 }
 0x1cd   : > { %v2950_v39 = vpop.f32.mrf.mxu1  ;;  %v1151_v3 = vadd.f32 %v1150_v38, %v1018_v7 }
 0x1ce   : > { %v2964_v8 = vpop.f32.mrf.mxu0 }
 0x1cf   : > { %v3647_v40 = vpop.f32.mrf.mxu1  ;;  %v1166_v33 = vadd.f32 %v2964_v8, %v2950_v39 }
 0x1d0   : > { %v1160_v9 = vpop.f32.mrf.mxu0 }
 0x1d1   : > { %v2969_v41 = vpop.f32.mrf.mxu1  ;;  %v1161_v5 = vadd.f32 %v1160_v9, %v3647_v40 }
 0x1d2   : > { %v2983_v42 = vpop.f32.mrf.mxu0  ;;  %v1312_v18 = vadd.f32 %v2969_v41, %v1136_v14 }
 0x1d3   : > { %v1272_v10 = vpop.f32.mrf.mxu1 }
 0x1d4   : > { %v1422_v43 = vpop.f32.mrf.mxu0  ;;  %v1311_v22 = vadd.f32 %v1272_v10, %v1131_v17  ;;  %v1462_v25 = vadd.f32 %v2983_v42, %v1312_v18 }
 0x1d5   : > { %v2972_v44 = vpop.f32.mrf.mxu1 }
 0x1d6   : > { %v2986_v45 = vpop.f32.mrf.mxu0  ;;  %v1314_v26 = vadd.f32 %v2972_v44, %v1146_v21  ;;  %v1461_v30 = vadd.f32 %v1422_v43, %v1311_v22 }
 0x1d7   : > { %v1282_v46 = vpop.f32.mrf.mxu1 }
 0x1d8   : > { %v1432_v47 = vpop.f32.mrf.mxu0  ;;  %v1313_v31 = vadd.f32 %v1282_v46, %v1141_v24 }
 0x1d9   : > { %v2975_v48 = vpop.f32.mrf.mxu1 }
 0x1da   : > { %v2989_v49 = vpop.f32.mrf.mxu0  ;;  %v1463_v4 = vadd.f32 %v1432_v47, %v1313_v31 }
 0x1db   : > { %v1292_v50 = vpop.f32.mrf.mxu1 }
 0x1dc   : > { %v1442_v51 = vpop.f32.mrf.mxu0  ;;  %v1315_v34 = vadd.f32 %v1292_v50, %v1151_v3 }
 0x1dd   : > { %v2978_v52 = vpop.f32.mrf.mxu1 }
 0x1de   : > { %v2992_v53 = vpop.f32.mrf.mxu0  ;;  %v1318_v42 = vadd.f32 %v2978_v52, %v1166_v33 }
 0x1df   : > { %v1302_v54 = vpop.f32.mrf.mxu1 }
 0x1e0   : > { %v3649_v55 = vpop.f32.mrf.mxu0 }
 0x1e1   : > { %v2997_v56 = vpop.f32.mrf.mxu1 }
 0x1e2   : > { %v3011_v57 = vpop.f32.mrf.mxu0 }
 0x1e3   : > { %v1572_v58 = vpop.f32.mrf.mxu1 }
 0x1e4   : > { %v1722_v59 = vpop.f32.mrf.mxu0  ;;  %v1611_v32 = vadd.f32 %v1572_v58, %v1461_v30  ;;  %v1468_v58 = vadd.f32 %v2992_v53, %v1318_v42 }
 0x1e5   : > { %v3000_v60 = vpop.f32.mrf.mxu1 }
 0x1e6   : > { %v3014_v61 = vpop.f32.mrf.mxu0  ;;  %v1761_v37 = vadd.f32 %v1722_v59, %v1611_v32 }
 0x1e7   : > { %v1582_v62 = vpop.f32.mrf.mxu1 }
 0x1e8   : > { %v1732_v63 = vpop.f32.mrf.mxu0  ;;  %v1613_v43 = vadd.f32 %v1582_v62, %v1463_v4 }
 0x1e9   : > { %v3003_v0 = vpop.f32.mrf.mxu1 }
 0x1ea   : > { %v3017_v1 = vpop.f32.mrf.mxu0  ;;  %v1763_v50 = vadd.f32 %v1732_v63, %v1613_v43 }
 0x1eb   : > { %v1592_v6 = vpop.f32.mrf.mxu1 }
 0x1ec   : > { %v3651_v11 = vpop.f32.mrf.mxu0 }
 0x1ed   : > { %3774 = vst [vmem:[#allocation6_spill] sm:$0xff] %v3651_v11  ;;  %v3006_v12 = vpop.f32.mrf.mxu1  ;;  %v1464_v11 = vadd.f32 %v2986_v45, %v1314_v26  ;;  %v1465_v45 = vadd.f32 %v1442_v51, %v1315_v34  ;;  %v2769_v51 = vld [vmem:[%s3762_s6] ss:$0 sm:$0xff] }
 0x1ee   : > { %v3653_v13 = vpop.f32.mrf.mxu0  ;;  %v1618_v9 = vadd.f32 %v3006_v12, %v1468_v58 }
 0x1ef   : > { %3775 = vst [vmem:[#allocation7_spill] sm:$0xff] %v3653_v13  ;;  %v1602_v15 = vpop.f32.mrf.mxu1  ;;  %v1612_v13 = vadd.f32 %v2997_v56, %v1462_v25  ;;  %v1614_v35 = vadd.f32 %v3000_v60, %v1464_v11  ;;  %v1317_v56 = vadd.f32 %v1302_v54, %v1161_v5 }
 0x1f0   : > { %v3655_v16 = vpop.f32.mrf.mxu0 }
 0x1f1   : > { %3776 = vst [vmem:[#allocation8_spill] sm:$0xff] %v3655_v16  ;;  %v3025_v19 = vpop.f32.mrf.mxu1  ;;  %v1316_v16 = vadd.f32 %v2975_v48, %v1156_v29  ;;  %v1762_v10 = vadd.f32 %v3011_v57, %v1612_v13  ;;  %v1764_v48 = vadd.f32 %v3014_v61, %v1614_v35  ;;  %v1615_v57 = vadd.f32 %v1592_v6, %v1465_v45 }
 0x1f2   : > { %v3039_v20 = vpop.f32.mrf.mxu0  ;;  %v1467_v40 = vadd.f32 %v3649_v55, %v1317_v56 }
 0x1f3   : > { %v1873_v23 = vpop.f32.mrf.mxu1  ;;  %v1466_v36 = vadd.f32 %v2989_v49, %v1316_v16  ;;  %v1913_v46 = vadd.f32 %v3025_v19, %v1762_v10 }
 0x1f4   : > { %v2023_v27 = vpop.f32.mrf.mxu0  ;;  %v1912_v8 = vadd.f32 %v1873_v23, %v1761_v37  ;;  %v3777_v13 = vld [vmem:[#allocation6_spill] sm:$0xff] }
 0x1f5   : > { %v3028_v28 = vpop.f32.mrf.mxu1  ;;  %v1616_v39 = vadd.f32 %v3003_v0, %v1466_v36  ;;  %v2063_v60 = vadd.f32 %v3039_v20, %v1913_v46  ;;  %v1617_v0 = vadd.f32 %v1602_v15, %v1467_v40  ;;  %v1765_v63 = vadd.f32 %v3777_v13, %v1615_v57 }
 0x1f6   : > { %v3042_v41 = vpop.f32.mrf.mxu0  ;;  %v1915_v11 = vadd.f32 %v3028_v28, %v1764_v48  ;;  %v2062_v62 = vadd.f32 %v2023_v27, %v1912_v8  ;;  %v3778_v18 = vld [vmem:[#allocation7_spill] sm:$0xff] }
 0x1f7   : > { %v1883_v2 = vpop.f32.mrf.mxu1  ;;  %v1766_v59 = vadd.f32 %v3017_v1, %v1616_v39  ;;  %v1768_v55 = vadd.f32 %v3778_v18, %v1618_v9 }
 0x1f8   : > { %v2033_v7 = vpop.f32.mrf.mxu0  ;;  %v1914_v54 = vadd.f32 %v1883_v2, %v1763_v50  ;;  %v2065_v6 = vadd.f32 %v3042_v41, %v1915_v11  ;;  %v3779_v24 = vld [vmem:[#allocation8_spill] sm:$0xff]  ;;  %v2780_v11 = vld [vmem:[%s3766_s10] ss:$0 sm:$0xff] }
 0x1f9   : > { %v3031_v14 = vpop.f32.mrf.mxu1  ;;  %v1767_v25 = vadd.f32 %v3779_v24, %v1617_v0 }
 0x1fa   : > { %v3045_v49 = vpop.f32.mrf.mxu0  ;;  %v1917_v16 = vadd.f32 %v3031_v14, %v1766_v59  ;;  %v2064_v1 = vadd.f32 %v2033_v7, %v1914_v54 }
 0x1fb   : > { %v1893_v44 = vpop.f32.mrf.mxu1 }
 0x1fc   : > { %v2043_v12 = vpop.f32.mrf.mxu0  ;;  %v1916_v21 = vadd.f32 %v1893_v44, %v1765_v63  ;;  %v2067_v27 = vadd.f32 %v3045_v49, %v1917_v16 }
 0x1fd   : > { %v3034_v38 = vpop.f32.mrf.mxu1 }
 0x1fe   : > { %v1919_v15 = vadd.f32 %v3034_v38, %v1768_v55  ;;  %v3048_v30 = vpop.f32.mrf.mxu0  ;;  %v2066_v32 = vadd.f32 %v2043_v12, %v1916_v21 }
 0x1ff   : > { %v1903_v47 = vpop.f32.mrf.mxu1 }
 0x200   : > { %v1918_v33 = vadd.f32 %v1903_v47, %v1767_v25  ;;  %v2069_v34 = vadd.f32 %v3048_v30, %v1919_v15  ;;  %v2053_v5 = vpop.f32.mrf.mxu0 }
 0x201   : > { %v3053_v52 = vpop.f32.mrf.mxu1 }
 0x202   : > { %v2213_v61 = vadd.f32 %v3053_v52, %v2063_v60  ;;  %v2068_v37 = vadd.f32 %v2053_v5, %v1918_v33  ;;  %v2770_v60 = vld [vmem:[%s3764_s8] ss:$0 sm:$0xff] }
 0x203   : > { %v2173_v53 = vpop.f32.mrf.mxu1 }
 0x204   : > { %v2212_v17 = vadd.f32 %v2173_v53, %v2062_v62  ;;  %v2227_v19 = vadd.f32 %v2769_v51, %v2213_v61 }
 0x205   : > { %v3056_v20 = vpop.f32.mrf.mxu1 }
 0x206   : > { %v2226_v22 = vadd.f32 %v2769_v51, %v2212_v17  ;;  %v2215_v23 = vadd.f32 %v3056_v20, %v2065_v6  ;;  %v2235_v31 = vmax.f32 %v2227_v19, 0.0 }
 0x207   : > { %v2183_v26 = vpop.f32.mrf.mxu1 }
 0x208   : > { %v2234_v28 = vmax.f32 %v2226_v22, 0.0  ;;  %v2214_v29 = vadd.f32 %v2183_v26, %v2064_v1  ;;  %v2229_v2 = vadd.f32 %v2769_v51, %v2215_v23 }
 0x209   : > { %v3059_v3 = vpop.f32.mrf.mxu1 }
 0x20a   : > { %v2228_v41 = vadd.f32 %v2769_v51, %v2214_v29  ;;  %v2217_v14 = vadd.f32 %v3059_v3, %v2067_v27  ;;  %3065 = vmatprep.mubr.msk.f32.mxu0 %vm550_vm2, %v2234_v28  ;;  %v2237_v42 = vmax.f32 %v2229_v2, 0.0 }
 0x20b   : > { %v2193_v4 = vpop.f32.mrf.mxu1  ;;  %3066 = vmatmul.mubr.msk.f32.vlgmr.msra.gmra.mxu0 %vm550_vm2, %v2235_v31 }
 0x20c   : > { %v2236_v10 = vmax.f32 %v2228_v41, 0.0  ;;  %v2216_v35 = vadd.f32 %v2193_v4, %v2066_v32  ;;  %v2231_v44 = vadd.f32 %v2769_v51, %v2217_v14 }
 0x20d   : > { %v3062_v36 = vpop.f32.mrf.mxu1 }
 0x20e   : > { %v2230_v43 = vadd.f32 %v2769_v51, %v2216_v35  ;;  %v2219_v46 = vadd.f32 %v3062_v36, %v2069_v34  ;;  %3068 = vmatprep.mubr.msk.f32.mxu0 %vm550_vm2, %v2236_v10  ;;  %v2239_v45 = vmax.f32 %v2231_v44, 0.0 }
 0x20f   : > { %v2203_v56 = vpop.f32.mrf.mxu1  ;;  %3069 = vmatmul.mubr.msk.f32.gmra.mxu0 %vm550_vm2, %v2237_v42 }
 0x210   : > { %v2238_v7 = vmax.f32 %v2230_v43, 0.0  ;;  %v2218_v38 = vadd.f32 %v2203_v56, %v2068_v37  ;;  %v2233_v48 = vadd.f32 %v2769_v51, %v2219_v46 }
 0x211   : > { %v3081_v47 = vpop.f32.mrf.mxu1 }
 0x212   : > { %v2232_v39 = vadd.f32 %v2769_v51, %v2218_v38  ;;  %3071 = vmatprep.mubr.msk.f32.mxu0 %vm550_vm2, %v2238_v7  ;;  %v2241_v58 = vmax.f32 %v2233_v48, 0.0  ;;  %v2473_v52 = vadd.f32 %v3081_v47, %v2780_v11 }
 0x213   : > { %3072 = vmatmul.mubr.msk.f32.gmra.mxu0 %vm550_vm2, %v2239_v45  ;;  %v2467_v50 = vpop.f32.mrf.mxu1 }
 0x214   : > { %v2240_v8 = vmax.f32 %v2232_v39, 0.0  ;;  %v2468_v61 = vadd.f32 %v2780_v11, %v2467_v50 }
 0x215   : > { %v3084_v57 = vpop.f32.mrf.mxu1 }
 0x216   : > { %3074 = vmatprep.mubr.msk.f32.mxu0 %vm550_vm2, %v2240_v8  ;;  %v2483_v6 = vadd.f32 %v3084_v57, %v2780_v11 }
 0x217   : > { %3075 = vmatmul.mubr.msk.f32.gmra.mxu0 %vm550_vm2, %v2241_v58  ;;  %v2477_v40 = vpop.f32.mrf.mxu1 }
 0x218   : > { %v2478_v19 = vadd.f32 %v2780_v11, %v2477_v40 }
 0x219   : > { %v3087_v62 = vpop.f32.mrf.mxu1 }
 0x21a   : > { %v2493_v23 = vadd.f32 %v3087_v62, %v2780_v11 }
 0x21b   : > { %v2487_v17 = vpop.f32.mrf.mxu1 }
 0x21c   : > { %v2488_v28 = vadd.f32 %v2780_v11, %v2487_v17 }
 0x21d   : > { %v3090_v25 = vpop.f32.mrf.mxu1 }
 0x21e   : > { %v2503_v3 = vadd.f32 %v3090_v25, %v2780_v11 }
 0x21f   : > { %v2497_v33 = vpop.f32.mrf.mxu1 }
 0x220   : > { %v2498_v35 = vadd.f32 %v2780_v11, %v2497_v33 }
 0x2cb   : > { %v3067_v9 = vpop.f32.mrf.mxu0 }
 0x2cc   : > { %v2349_v49 = vadd.f32 %v3067_v9, %v2770_v60 }
 0x2cd   : > { %v2343_v59 = vpop.f32.mrf.mxu0 }
 0x2ce   : > { %v2383_v54 = vmax.f32 %v2349_v49, 0.0  ;;  %v2344_v51 = vadd.f32 %v2770_v60, %v2343_v59 }
 0x2cf   : > { %v3070_v0 = vpop.f32.mrf.mxu0 }
 0x2d0   : > { %v2507_v53 = vadd.f32 %v2473_v52, %v2383_v54  ;;  %v2382_v13 = vmax.f32 %v2344_v51, 0.0  ;;  %v2359_v63 = vadd.f32 %v3070_v0, %v2770_v60 }
 0x2d1   : > { %v2353_v16 = vpop.f32.mrf.mxu0 }
 0x2d2   : > { %2516 = vst.msk [vmem:[%s3682_s13 + $0x8] sm:$0xff] %vm2514_vm4, %v2507_v53  ;;  %v2506_v18 = vadd.f32 %v2468_v61, %v2382_v13  ;;  %v2385_v55 = vmax.f32 %v2359_v63, 0.0  ;;  %v2354_v12 = vadd.f32 %v2770_v60, %v2353_v16 }
 0x2d3   : > { %v3073_v20 = vpop.f32.mrf.mxu0 }
 0x2d4   : > { %2515 = vst.msk [vmem:[%s3682_s13] sm:$0xff] %vm2514_vm4, %v2506_v18  ;;  %v2509_v1 = vadd.f32 %v2483_v6, %v2385_v55  ;;  %v2384_v21 = vmax.f32 %v2354_v12, 0.0  ;;  %v2369_v22 = vadd.f32 %v3073_v20, %v2770_v60 }
 0x2d5   : > { %v2363_v24 = vpop.f32.mrf.mxu0 }
 0x2d6   : > { %2518 = vst.msk [vmem:[%s3682_s13 + $0x18] sm:$0xff] %vm2514_vm4, %v2509_v1  ;;  %v2508_v26 = vadd.f32 %v2478_v19, %v2384_v21  ;;  %v2387_v27 = vmax.f32 %v2369_v22, 0.0  ;;  %v2364_v15 = vadd.f32 %v2770_v60, %v2363_v24 }
 0x2d7   : > { %v3076_v29 = vpop.f32.mrf.mxu0 }
 0x2d8   : > { %2517 = vst.msk [vmem:[%s3682_s13 + $0x10] sm:$0xff] %vm2514_vm4, %v2508_v26  ;;  %v2511_v30 = vadd.f32 %v2493_v23, %v2387_v27  ;;  %v2386_v31 = vmax.f32 %v2364_v15, 0.0  ;;  %v2379_v2 = vadd.f32 %v3076_v29, %v2770_v60 }
 0x2d9   : > { %v2373_v32 = vpop.f32.mrf.mxu0 }
 0x2da   : > { %2520 = vst.msk [vmem:[%s3682_s13 + $0x28] sm:$0xff] %vm2514_vm4, %v2511_v30  ;;  %v2510_v41 = vadd.f32 %v2488_v28, %v2386_v31  ;;  %v2389_v14 = vmax.f32 %v2379_v2, 0.0  ;;  %v2374_v4 = vadd.f32 %v2770_v60, %v2373_v32 }
 0x2dc   : > { %2519 = vst.msk [vmem:[%s3682_s13 + $0x20] sm:$0xff] %vm2514_vm4, %v2510_v41  ;;  %v2513_v34 = vadd.f32 %v2503_v3, %v2389_v14  ;;  %v2388_v10 = vmax.f32 %v2374_v4, 0.0 }
 0x2de   : > { %2522 = vst.msk [vmem:[%s3682_s13 + $0x38] sm:$0xff] %vm2514_vm4, %v2513_v34  ;;  %v2512_v5 = vadd.f32 %v2498_v35, %v2388_v10 }
 0x2e0   : > { %2521 = vst.msk [vmem:[%s3682_s13 + $0x30] sm:$0xff] %vm2514_vm4, %v2512_v5 }
 0x2e1   : > { %3163 = shalt.err (!%p3160_p5)
}
 0x2e2   : > { %s3164_s24 = scalar_lea.hbm %s3701_s26, 1024  ;;  %s3168_s12 = scalar_lea.hbm %s3767_s11, 2048 }
 0x2e3   : > { %p3165_p6 = scmp.ne.s32.totalorder %s3701_s26, %s3164_s24  ;;  %p3169_p10 = scmp.lt.s32.totalorder %s3701_s26, %s3767_s11 }
 0x2e4   : > { %p3170_p11 = scmp.lt.s32.totalorder %s3168_s12, %s3164_s24 }
 0x2e5   : > { %p3166_p7 = pnand %p3165_p6, %p3333_p4 }
 0x2e6   : > { %p3171_p12 = por %p3170_p11, %p3169_p10 }
 0x2e7   : > { %p3167_p9 = pneg %p3166_p7 }
 0x2e9   : > { %p3172_p13 = pnand %p3171_p12, %p3167_p9 }
 0x2eb   : > { %3175 = shalt.err (!%p3172_p13)
}
 0x2ec   : > { %s3231_s28 = smov 128   ;;  %s3232_s14 = smov 8  }
 0x2ed   : > { %3091 = dma.vmem_to_hbm [thread:$0]  (%p3333_p4), %s3703_s16, 1024, %s3701_s26, %s3711_s20, %s3231_s28, %s3231_s28, %s3232_s14  }
 0x2ee PF: > { %p3097_p0 = scmp.ge.s32.totalorder %s3226_s22, 2  ;;  %s2554_s23 = sand.u32 1, %s3206_s17  }
 0x2ef   : > { %s2555_s0 = scalar_lea.sflag [#allocation4], %s2554_s23 }
 0x2f0   : > { %p3094_p1 = pnand %p3097_p0, %p3340_p8 }
 0x2f2   : > { %p3095_p2 = pneg %p3094_p1 }
 0x2f4   : > { %3201 = dma.done.wait (%p3095_p2), %s2555_s0, 1024  }
 0x2f5   : > { %3203 = vsyncadd (%p3095_p2), %s2555_s0, 4294966272  ;;  %s24_s22 = sadd.s32 1, %s3226_s22   ;;  %s3780_s17 = smov %s3210_s18 }
 0x2f6   : > { %p21_p3 = scmp.ge.s32.totalorder %s24_s22, 4   ;;  %s3781_s18 = smov %s3214_s19 }
 0x2f7   : > { %s3782_s19 = smov %s3346_s30  ;;  %s3783_s20 = smov %s3222_s21 }
 0x2f8   : > { %s3784_s21 = smov %s3786_s25  ;;  %23 = sbr.rel (!%p21_p3) target bundleno = 7 (0x7), region = 116 }
 0x2fd   :  { %2560 = vsyncpa [#allocation4], 1 }
 0x2fe   :  { %2562 = vsyncpa [#allocation4 + $0x1], 1 }

// kernel: tpu_custom_call.1
= control target key start
LH: loop header
LB: loop body
LE: loop exit
PB: predicated region body
PF: predicated region fallthrough
CT: control target
= control target key end

     0   :  { %s3756_s0 = inlined_call_operand.vmem [shape: f32[2,8,8,4], index: 0, kind: input, shape index: {}]   ;;  %s3757_s1 = inlined_call_operand.vmem [shape: f32[2,8,8,4], index: 1, kind: input, shape index: {}]   ;;  %s3758_s2 = inlined_call_operand.vmem [shape: f32[2,8,8,4], index: 2, kind: input, shape index: {}]   ;;  %s3759_s3 = inlined_call_operand.vmem [shape: f32[4,4], index: 3, kind: input, shape index: {}]   ;;  %s3760_s4 = inlined_call_operand.vmem [shape: f32[1,4], index: 4, kind: input, shape index: {}]   ;;  %s3761_s5 = inlined_call_operand.vmem [shape: f32[9,4,4], index: 5, kind: input, shape index: {}]   ;;  %s3762_s6 = inlined_call_operand.vmem [shape: f32[1,4], index: 6, kind: input, shape index: {}]   ;;  %s3763_s7 = inlined_call_operand.vmem [shape: f32[4,8], index: 7, kind: input, shape index: {}]   ;;  %s3764_s8 = inlined_call_operand.vmem [shape: f32[1,8], index: 8, kind: input, shape index: {}]   ;;  %s3765_s9 = inlined_call_operand.vmem [shape: f32[4,8], index: 9, kind: input, shape index: {}]   ;;  %s3766_s10 = inlined_call_operand.vmem [shape: f32[1,8], index: 10, kind: input, shape index: {}]   ;;  %s3767_s11 = inlined_call_operand.hbm [shape: f32[2,8,8,8], index: 11, kind: output, shape index: {}]  }
   0x1   :  { %3768 = sst [smem:[#allocation9_spill]] %s3756_s0 }
   0x2   :  { %3769 = sst [smem:[#allocation10_spill]] %s3757_s1 }
   0x3   :  { %16 = vsyncpa [#allocation4], 0 }
   0x4   :  { %18 = vsyncpa [#allocation4 + $0x1], 0  ;;  %s3293_s17 = smov 0   ;;  %s3295_s18 = smov 0  }
   0x5   :  { %s3297_s19 = smov 0   ;;  %s3299_s20 = smov 0  }
   0x6   :  { %s3301_s21 = smov 0   ;;  %s3303_s22 = smov 0  }
   0x7 LB: > { %s2654_s23 = sadd.s32 4294967295, %s3226_s22   ;;  %s2655_s24 = sadd.s32 4294967294, %s3226_s22   ;;  %s3226_s22 = sphi %s3303_s22, %s24_s22   ;;  %s3222_s21 = sphi %s3301_s21, %s3784_s21   ;;  %s3218_s20 = sphi %s3299_s20, %s3783_s20   ;;  %s3214_s19 = sphi %s3297_s19, %s3782_s19   ;;  %s3210_s18 = sphi %s3295_s18, %s3781_s18   ;;  %s3206_s17 = sphi %s3293_s17, %s3780_s17  }
   0x8   : > { %s36_s25 = sadd.s32 1, %s3222_s21  ;;  %s313_s26 = sadd.s32 1, %s3214_s19 }
   0x9   : > { %p38_p0 = scmp.ge.s32.totalorder %s36_s25, 2  ;;  %p323_p1 = scmp.ne.s32.totalorder %s3214_s19, %s3210_s18 }
   0xa   : > { %p324_p2 = scmp.eq.s32.totalorder %s2654_s23, 1  ;;  %p329_p3 = scmp.ne.s32.totalorder %s3210_s18, %s3206_s17 }
   0xb   : > { %s3786_s25 = smov (%p38_p0, %s36_s25), 0  ;;  %p330_p5 = scmp.eq.s32.totalorder %s2655_s24, 1 }
   0xc   : > { %p3333_p4 = por %p324_p2, %p323_p1  ;;  %s308_s28 = ssub.s32 %s3222_s21, %s3786_s25 }
   0xd   : > { %p2658_p6 = scmp.ge.s32.totalorder %s3226_s22, 1  ;;  %p311_p7 = scmp.eq.s32.totalorder %s308_s28, 0 }
   0xe   : > { %p3340_p8 = por %p330_p5, %p329_p3  ;;  %p423_p9 = scmp.lt.s32.totalorder %s3226_s22, 3 }
   0xf   : > { %s3346_s30 = scalar_select %p311_p7, %s3214_s19, %s313_s26  }
  0x10   : > { %p424_p10 = pnand %p2658_p6, %p423_p9 }
  0x12   : > { %427 = sbr.rel (%p424_p10) target bundleno = 750 (0x2ee), region = 64 }
  0x17   : > { %v534_v0 = vld [vmem:[%s3759_s3] sm:$0xf]  ;;  %vm575_vm0 = vcmask 1043456   ;;  %p492_p11 = scmp.lt.s32.totalorder %s3218_s20, 1  ;;  %v3228_v1 = vmov 0.0   ;;  %vm3229_vm1 = vmmov 0  }
  0x18   : > { %2913 = vmatprep.subr.msk.mxu0 %vm575_vm0, %v534_v0  ;;  %2932 = vmatprep.subr.mxu1 %v3228_v1  ;;  %vm550_vm2 = vcmask 31744   ;;  %s3772_s0 = sld [smem:[#allocation9_spill]]  ;;  %vm852_vm3 = vcmask 24576   ;;  %v2680_v12 = vld [vmem:[%s3761_s5 + $0x4] sm:$0xf]  ;;  %vm2514_vm4 = vcmask 64512  }
  0x19   : > { %2914 = vmatpush3.msk.msra.mxu0 %vm575_vm0, %v534_v0  ;;  %s493_s14 = scalar_select %p492_p11, %s3218_s20, 1  ;;  %2933 = vmatpush3.msk.msra.mxu1 %vm575_vm0, %v534_v0  ;;  %853 = vst.msk [vmem:[#allocation2] sm:$0x1] %vm852_vm3, %v3228_v1  ;;  %854 = vst.msk [vmem:[#allocation2 + $0x10] sm:$0x1] %vm852_vm3, %v3228_v1 }
  0x1a   : > { %2927 = vmatprep.subr.mxu0 %v3228_v1  ;;  %2934 = vmatprep.mubr.msk.f32.mxu1 %vm3229_vm1, %v3228_v1  ;;  %s3773_s1 = sld [smem:[#allocation10_spill]]  ;;  %855 = vst.msk [vmem:[#allocation2 + $0x20] sm:$0x1] %vm852_vm3, %v3228_v1  ;;  %856 = vst.msk [vmem:[#allocation2 + $0x30] sm:$0x1] %vm852_vm3, %v3228_v1 }
  0x1b   : > { %s2795_s15 = sshll.u32 %s493_s14, 6  ;;  %857 = vst.msk [vmem:[#allocation2 + $0x40] sm:$0x1] %vm852_vm3, %v3228_v1  ;;  %858 = vst.msk [vmem:[#allocation2 + $0x50] sm:$0x1] %vm852_vm3, %v3228_v1  ;;  %2937 = vmatprep.subr.msk.mxu1 %vm575_vm0, %v2680_v12  ;;  %s2799_s14 = sshll.u32 %s3218_s20, 10 }
  0x1c   : > { %s2798_s26 = sadd.s32 56, %s2795_s15  ;;  %859 = vst.msk [vmem:[#allocation2 + $0x60] sm:$0x1] %vm852_vm3, %v3228_v1  ;;  %860 = vst.msk [vmem:[#allocation2 + $0x70] sm:$0x1] %vm852_vm3, %v3228_v1 }
  0x1d   : > { %s528_s13 = scalar_lea.vmem %s3758_s2, %s2798_s26  ;;  %861 = vst.msk [vmem:[#allocation2 + $0x80] sm:$0x1] %vm852_vm3, %v3228_v1  ;;  %862 = vst.msk [vmem:[#allocation2 + $0x90] sm:$0x1] %vm852_vm3, %v3228_v1  ;;  %v894_v13 = vld [vmem:[%s3761_s5] sm:$0xf]  ;;  %s3701_s26 = scalar_lea.hbm %s3767_s11, %s2799_s14 }
  0x1e   : > { %s499_s24 = scalar_lea.vmem %s3772_s0, %s2795_s15  ;;  %v767_v6 = vld [vmem:[%s528_s13] sm:$0xff]  ;;  %863 = vst.msk [vmem:[#allocation2 + $0x9] sm:$0x1] %vm852_vm3, %v3228_v1  ;;  %864 = vst.msk [vmem:[#allocation2 + $0x19] sm:$0x1] %vm852_vm3, %v3228_v1 }
  0x1f   : > { %v3360_v2 = vld [vmem:[%s499_s24] sm:$0xff]  ;;  %v3362_v3 = vld [vmem:[%s499_s24 + $0x8] sm:$0xff]  ;;  %v3364_v4 = vld [vmem:[%s499_s24 + $0x10] sm:$0xff]  ;;  %2935 = vmatmul.mubr.msk.f32.vlgmr.msra.gmra.mxu1 %vm550_vm2, %v767_v6  ;;  %865 = vst.msk [vmem:[#allocation2 + $0x29] sm:$0x1] %vm852_vm3, %v3228_v1 }
  0x20   : > { %2915 = vmatprep.mubr.msk.f32.mxu0 %vm550_vm2, %v3360_v2  ;;  %v3376_v5 = vld [vmem:[%s499_s24 + $0x18] sm:$0xff]  ;;  %v3378_v7 = vld [vmem:[%s499_s24 + $0x20] sm:$0xff]  ;;  %v3385_v8 = vld [vmem:[%s499_s24 + $0x28] sm:$0xff]  ;;  %s512_s23 = scalar_lea.vmem %s3773_s1, %s2795_s15  ;;  %866 = vst.msk [vmem:[#allocation2 + $0x39] sm:$0x1] %vm852_vm3, %v3228_v1  ;;  %2938 = vmatpush3.msk.msra.mxu1 %vm575_vm0, %v2680_v12 }
  0x21   : > { %2916 = vmatmul.mubr.msk.f32.vlgmr.msra.gmra.mxu0 %vm550_vm2, %v3362_v3  ;;  %v3387_v9 = vld [vmem:[%s499_s24 + $0x30] sm:$0xff]  ;;  %v3393_v10 = vld [vmem:[%s499_s24 + $0x38] sm:$0xff]  ;;  %v692_v11 = vld [vmem:[%s512_s23] sm:$0xff]  ;;  %867 = vst.msk [vmem:[#allocation2 + $0x49] sm:$0x1] %vm852_vm3, %v3228_v1  ;;  %s488_s24 = sand.u32 1, %s3210_s18  }
  0x22   : > { %2928 = vmatpush3.msk.msra.mxu0 %vm575_vm0, %v534_v0  ;;  %2918 = vmatprep.mubr.msk.f32.mxu0 %vm550_vm2, %v3364_v4  ;;  %868 = vst.msk [vmem:[#allocation2 + $0x59] sm:$0x1] %vm852_vm3, %v3228_v1  ;;  %869 = vst.msk [vmem:[#allocation2 + $0x69] sm:$0x1] %vm852_vm3, %v3228_v1  ;;  %v2699_v14 = vld [vmem:[%s3761_s5 + $0x8] sm:$0xf] }
  0x23   : > { %870 = vst.msk [vmem:[#allocation2 + $0x79] sm:$0x1] %vm852_vm3, %v3228_v1  ;;  %871 = vst.msk [vmem:[#allocation2 + $0x89] sm:$0x1] %vm852_vm3, %v3228_v1  ;;  %2951 = vmatprep.subr.msk.mxu0 %vm575_vm0, %v894_v13  ;;  %2965 = vmatprep.subr.msk.mxu1 %vm575_vm0, %v2699_v14  ;;  %v2709_v15 = vld [vmem:[%s3761_s5 + $0xc] sm:$0xf] }
  0x24   : > { %872 = vst.msk [vmem:[#allocation2 + $0x99] sm:$0x1] %vm852_vm3, %v3228_v1  ;;  %v2666_v16 = vld [vmem:[%s3760_s4] ss:$0 sm:$0xff]  ;;  %v2719_v56 = vld [vmem:[%s3761_s5 + $0x10] sm:$0xf] }
  0x25   : > { %2919 = vmatmul.mubr.msk.f32.gmra.mxu0 %vm550_vm2, %v3376_v5  ;;  %v2729_v57 = vld [vmem:[%s3761_s5 + $0x14] sm:$0xf]  ;;  %s2659_s12 = sshll.u32 %s488_s24, 6  ;;  %s3711_s20 = scalar_lea.sflag [#allocation4], %s488_s24 }
  0x26   : > { %2921 = vmatprep.mubr.msk.f32.mxu0 %vm550_vm2, %v3378_v7  ;;  %s3682_s13 = scalar_lea.vmem [#allocation3], %s2659_s12  ;;  %s3230_s12 = smov [#allocation3]  }
  0x27   : > { %s2539_s16 = sshll.u32 %s3682_s13, 4  ;;  %s3154_s14 = sshll.u32 %s3230_s12, 4  ;;  %s3703_s16 = int_to_ptr.vmem [resolvable:$true] %s2539_s16  ;;  %s3155_s14 = int_to_ptr.vmem [resolvable:$false] %s3154_s14 }
  0x28   : > { %s3150_s28 = scalar_lea.vmem %s3703_s16, 1024  ;;  %s3156_s23 = scalar_lea.vmem %s3155_s14, 2048 }
  0x29   : > { %2922 = vmatmul.mubr.msk.f32.gmra.mxu0 %vm550_vm2, %v3385_v8  ;;  %p3151_p12 = scmp.ne.s32.totalorder %s3703_s16, %s3150_s28  ;;  %p3157_p1 = scmp.lt.s32.totalorder %s3703_s16, %s3155_s14 }
  0x2a   : > { %2924 = vmatprep.mubr.msk.f32.mxu0 %vm550_vm2, %v3387_v9  ;;  %p3158_p2 = scmp.lt.s32.totalorder %s3156_s23, %s3150_s28 }
  0x2b   : > { %p3152_p13 = pnand %p3151_p12, %p3333_p4 }
  0x2c   : > { %p3159_p3 = por %p3158_p2, %p3157_p1 }
  0x2d   : > { %2925 = vmatmul.mubr.msk.f32.gmra.mxu0 %vm550_vm2, %v3393_v10  ;;  %p3153_p0 = pneg %p3152_p13 }
  0x2e   : > { %2929 = vmatprep.mubr.msk.f32.mxu0 %vm3229_vm1, %v3228_v1 }
  0x2f   : > { %p3160_p5 = pnand %p3159_p3, %p3153_p0 }
  0x31   : > { %2930 = vmatmul.mubr.msk.f32.vlgmr.msra.gmra.mxu0 %vm550_vm2, %v692_v11 }
  0x32   : > { %2952 = vmatpush3.msk.msra.mxu0 %vm575_vm0, %v894_v13 }
  0x33   : > { %2979 = vmatprep.subr.msk.mxu0 %vm575_vm0, %v2709_v15 }
  0xdf   : > { %v837_v20 = vpop.f32.mrf.mxu1 }
  0xe0   : > { %v838_v23 = vadd.f32 %v2666_v16, %v837_v20 }
  0xe1   : > { %v2917_v17 = vpop.f32.mrf.mxu0  ;;  %v2936_v25 = vpop.f32.mrf.mxu1 }
  0xe2   : > { %v651_v18 = vadd.f32 %v2917_v17, %v2666_v16  ;;  %v841_v28 = vmax.f32 %v838_v23, 0.0  ;;  %v2749_v17 = vld [vmem:[%s3761_s5 + $0x1c] sm:$0xf] }
  0xe3   : > { %v645_v19 = vpop.f32.mrf.mxu0 }
  0xe4   : > { %v685_v21 = vmax.f32 %v651_v18, 0.0  ;;  %v646_v22 = vadd.f32 %v2666_v16, %v645_v19  ;;  %v851_v32 = vmul.f32 0.0, %v841_v28 }
  0xe5   : > { %v2920_v24 = vpop.f32.mrf.mxu0 }
  0xe6   : > { %878 = vst.msk [vmem:[#allocation2 + $0x21] sm:$0xff] %vm550_vm2, %v685_v21  ;;  %v684_v26 = vmax.f32 %v646_v22, 0.0  ;;  %v661_v27 = vadd.f32 %v2920_v24, %v2666_v16  ;;  %875 = vst.msk [vmem:[#allocation2 + $0x91] sm:$0xff] %vm550_vm2, %v851_v32  ;;  %v2759_v24 = vld [vmem:[%s3761_s5 + $0x20] sm:$0xf] }
  0xe7   : > { %v655_v29 = vpop.f32.mrf.mxu0 }
  0xe8   : > { %877 = vst.msk [vmem:[#allocation2 + $0x11] sm:$0xff] %vm550_vm2, %v684_v26  ;;  %v687_v30 = vmax.f32 %v661_v27, 0.0  ;;  %v656_v31 = vadd.f32 %v2666_v16, %v655_v29 }
  0xe9   : > { %v2923_v33 = vpop.f32.mrf.mxu0 }
  0xea   : > { %880 = vst.msk [vmem:[#allocation2 + $0x41] sm:$0xff] %vm550_vm2, %v687_v30  ;;  %v686_v34 = vmax.f32 %v656_v31, 0.0  ;;  %v671_v35 = vadd.f32 %v2923_v33, %v2666_v16  ;;  %v2242_v30 = vld [vmem:[%s3763_s7] sm:$0xf] }
  0xeb   : > { %v665_v36 = vpop.f32.mrf.mxu0  ;;  %v2390_v31 = vld [vmem:[%s3765_s9] sm:$0xf] }
  0xec   : > { %879 = vst.msk [vmem:[#allocation2 + $0x31] sm:$0xff] %vm550_vm2, %v686_v34  ;;  %v689_v37 = vmax.f32 %v671_v35, 0.0  ;;  %v666_v38 = vadd.f32 %v2666_v16, %v665_v36 }
  0xed   : > { %v2926_v39 = vpop.f32.mrf.mxu0  ;;  %v3460_v55 = vld [vmem:[#allocation2 + $0x21] sm:$0xff]  ;;  %v1777_v27 = vld [vmem:[#allocation2 + $0x90] sm:$0xff] }
  0xee   : > { %882 = vst.msk [vmem:[#allocation2 + $0x61] sm:$0xff] %vm550_vm2, %v689_v37  ;;  %v688_v40 = vmax.f32 %v666_v38, 0.0  ;;  %v681_v41 = vadd.f32 %v2926_v39, %v2666_v16  ;;  %v3471_v58 = vld [vmem:[#allocation2 + $0x20] sm:$0xff]  ;;  %v1927_v28 = vld [vmem:[#allocation2 + $0x91] sm:$0xff] }
  0xef   : > { %v675_v42 = vpop.f32.mrf.mxu0  ;;  %v3455_v53 = vld [vmem:[#allocation2 + $0x11] sm:$0xff] }
  0xf0   : > { %881 = vst.msk [vmem:[#allocation2 + $0x51] sm:$0xff] %vm550_vm2, %v688_v40  ;;  %v691_v43 = vmax.f32 %v681_v41, 0.0  ;;  %v676_v44 = vadd.f32 %v2666_v16, %v675_v42  ;;  %v887_v54 = vld [vmem:[#allocation2 + $0x10] sm:$0xff] }
  0xf1   : > { %v762_v45 = vpop.f32.mrf.mxu0  ;;  %v3486_v61 = vld [vmem:[#allocation2 + $0x41] sm:$0xff]  ;;  %v2077_v29 = vld [vmem:[#allocation2 + $0x92] sm:$0xff] }
  0xf2   : > { %884 = vst.msk [vmem:[#allocation2 + $0x81] sm:$0xff] %vm550_vm2, %v691_v43  ;;  %v690_v46 = vmax.f32 %v676_v44, 0.0  ;;  %v763_v47 = vadd.f32 %v2666_v16, %v762_v45  ;;  %v3488_v62 = vld [vmem:[#allocation2 + $0x40] sm:$0xff]  ;;  %v2739_v16 = vld [vmem:[%s3761_s5 + $0x18] sm:$0xf] }
  0xf3   : > { %v2931_v48 = vpop.f32.mrf.mxu0  ;;  %v3476_v59 = vld [vmem:[#allocation2 + $0x31] sm:$0xff]  ;;  %v1173_v19 = vld [vmem:[#allocation2 + $0x42] sm:$0xff] }
  0xf4   : > { %883 = vst.msk [vmem:[#allocation2 + $0x71] sm:$0xff] %vm550_vm2, %v690_v46  ;;  %v766_v49 = vmax.f32 %v763_v47, 0.0  ;;  %v3478_v60 = vld [vmem:[#allocation2 + $0x30] sm:$0xff] }
  0xf5   : > { %v3502_v1 = vld [vmem:[#allocation2 + $0x61] sm:$0xff]  ;;  %v1172_v18 = vld [vmem:[#allocation2 + $0x32] sm:$0xff] }
  0xf6   : > { %v846_v50 = vmul.f32 0.0, %v766_v49  ;;  %v3504_v6 = vld [vmem:[#allocation2 + $0x60] sm:$0xff] }
  0xf7   : > { %v3494_v63 = vld [vmem:[#allocation2 + $0x51] sm:$0xff]  ;;  %v1175_v21 = vld [vmem:[#allocation2 + $0x62] sm:$0xff] }
  0xf8   : > { %873 = vst.msk [vmem:[#allocation2 + $0x1] sm:$0xff] %vm550_vm2, %v846_v50  ;;  %v3496_v0 = vld [vmem:[#allocation2 + $0x50] sm:$0xff] }
  0xf9   : > { %v1174_v20 = vld [vmem:[#allocation2 + $0x52] sm:$0xff]  ;;  %v1326_v23 = vld [vmem:[#allocation2 + $0x80] sm:$0xff] }
  0xfa   : > { %v1476_v25 = vld [vmem:[#allocation2 + $0x81] sm:$0xff] }
  0xfb   : > { %v3510_v11 = vld [vmem:[#allocation2 + $0x71] sm:$0xff]  ;;  %v1626_v26 = vld [vmem:[#allocation2 + $0x82] sm:$0xff] }
  0xfc   : > { %v3512_v12 = vld [vmem:[#allocation2 + $0x70] sm:$0xff] }
  0xfd   : > { %v1176_v22 = vld [vmem:[#allocation2 + $0x72] sm:$0xff] }
  0xff   : > { %v895_v51 = vld [vmem:[#allocation2 + $0x1] sm:$0xff] }
 0x100   : > { %v886_v52 = vld [vmem:[#allocation2] sm:$0xff]  ;;  %2939 = vmatprep.mubr.msk.f32.mxu1 %vm550_vm2, %v895_v51 }
 0x101   : > { %2953 = vmatprep.mubr.msk.f32.mxu0 %vm550_vm2, %v886_v52  ;;  %2940 = vmatmul.mubr.msk.f32.vlgmr.msra.gmra.mxu1 %vm550_vm2, %v3455_v53  ;;  %v1169_v13 = vld [vmem:[#allocation2 + $0x2] sm:$0xff] }
 0x102   : > { %2954 = vmatmul.mubr.msk.f32.vlgmr.msra.gmra.mxu0 %vm550_vm2, %v887_v54  ;;  %2966 = vmatpush3.msk.msra.mxu1 %vm575_vm0, %v2699_v14  ;;  %v1170_v14 = vld [vmem:[#allocation2 + $0x12] sm:$0xff] }
 0x103   : > { %2942 = vmatprep.mubr.msk.f32.mxu1 %vm550_vm2, %v3460_v55  ;;  %2956 = vmatprep.mubr.msk.f32.mxu0 %vm550_vm2, %v3471_v58 }
 0x104   : > { %2980 = vmatpush3.msk.msra.mxu0 %vm575_vm0, %v2709_v15  ;;  %2993 = vmatprep.subr.msk.mxu1 %vm575_vm0, %v2719_v56  ;;  %v3523_v15 = vld [vmem:[#allocation2 + $0x22] sm:$0xff] }
 0x105   : > { %3007 = vmatprep.subr.msk.mxu0 %vm575_vm0, %v2729_v57  ;;  %2943 = vmatmul.mubr.msk.f32.gmra.mxu1 %vm550_vm2, %v3476_v59 }
 0x106   : > { %2957 = vmatmul.mubr.msk.f32.gmra.mxu0 %vm550_vm2, %v3478_v60  ;;  %2945 = vmatprep.mubr.msk.f32.mxu1 %vm550_vm2, %v3486_v61 }
 0x107   : > { %2959 = vmatprep.mubr.msk.f32.mxu0 %vm550_vm2, %v3488_v62 }
 0x109   : > { %2946 = vmatmul.mubr.msk.f32.gmra.mxu1 %vm550_vm2, %v3494_v63 }
 0x10a   : > { %2960 = vmatmul.mubr.msk.f32.gmra.mxu0 %vm550_vm2, %v3496_v0  ;;  %2948 = vmatprep.mubr.msk.f32.mxu1 %vm550_vm2, %v3502_v1 }
 0x10b   : > { %2962 = vmatprep.mubr.msk.f32.mxu0 %vm550_vm2, %v3504_v6 }
 0x10d   : > { %2949 = vmatmul.mubr.msk.f32.gmra.mxu1 %vm550_vm2, %v3510_v11 }
 0x10e   : > { %2963 = vmatmul.mubr.msk.f32.gmra.mxu0 %vm550_vm2, %v3512_v12  ;;  %2967 = vmatprep.mubr.msk.f32.mxu1 %vm550_vm2, %v1169_v13 }
 0x10f   : > { %2981 = vmatprep.mubr.msk.f32.mxu0 %vm550_vm2, %v887_v54 }
 0x111   : > { %2968 = vmatmul.mubr.msk.f32.vlgmr.msra.gmra.mxu1 %vm550_vm2, %v1170_v14 }
 0x112   : > { %2982 = vmatmul.mubr.msk.f32.vlgmr.msra.gmra.mxu0 %vm550_vm2, %v3471_v58  ;;  %2994 = vmatpush3.msk.msra.mxu1 %vm575_vm0, %v2719_v56 }
 0x113   : > { %2970 = vmatprep.mubr.msk.f32.mxu1 %vm550_vm2, %v3523_v15  ;;  %2984 = vmatprep.mubr.msk.f32.mxu0 %vm550_vm2, %v3478_v60 }
 0x114   : > { %3008 = vmatpush3.msk.msra.mxu0 %vm575_vm0, %v2729_v57  ;;  %3021 = vmatprep.subr.msk.mxu1 %vm575_vm0, %v2739_v16 }
 0x115   : > { %3035 = vmatprep.subr.msk.mxu0 %vm575_vm0, %v2749_v17  ;;  %2971 = vmatmul.mubr.msk.f32.gmra.mxu1 %vm550_vm2, %v1172_v18 }
 0x116   : > { %2985 = vmatmul.mubr.msk.f32.gmra.mxu0 %vm550_vm2, %v3488_v62  ;;  %2973 = vmatprep.mubr.msk.f32.mxu1 %vm550_vm2, %v1173_v19 }
 0x117   : > { %2987 = vmatprep.mubr.msk.f32.mxu0 %vm550_vm2, %v3496_v0 }
 0x119   : > { %2974 = vmatmul.mubr.msk.f32.gmra.mxu1 %vm550_vm2, %v1174_v20 }
 0x11a   : > { %2988 = vmatmul.mubr.msk.f32.gmra.mxu0 %vm550_vm2, %v3504_v6  ;;  %2976 = vmatprep.mubr.msk.f32.mxu1 %vm550_vm2, %v1175_v21 }
 0x11b   : > { %2990 = vmatprep.mubr.msk.f32.mxu0 %vm550_vm2, %v3512_v12 }
 0x11d   : > { %2977 = vmatmul.mubr.msk.f32.gmra.mxu1 %vm550_vm2, %v1176_v22 }
 0x11e   : > { %2991 = vmatmul.mubr.msk.f32.gmra.mxu0 %vm550_vm2, %v1326_v23  ;;  %2995 = vmatprep.mubr.msk.f32.mxu1 %vm550_vm2, %v3455_v53 }
 0x11f   : > { %3009 = vmatprep.mubr.msk.f32.mxu0 %vm550_vm2, %v1170_v14 }
 0x121   : > { %2996 = vmatmul.mubr.msk.f32.vlgmr.msra.gmra.mxu1 %vm550_vm2, %v3460_v55 }
 0x122   : > { %3010 = vmatmul.mubr.msk.f32.vlgmr.msra.gmra.mxu0 %vm550_vm2, %v3523_v15  ;;  %3022 = vmatpush3.msk.msra.mxu1 %vm575_vm0, %v2739_v16 }
 0x123   : > { %2998 = vmatprep.mubr.msk.f32.mxu1 %vm550_vm2, %v3476_v59  ;;  %3012 = vmatprep.mubr.msk.f32.mxu0 %vm550_vm2, %v1172_v18 }
 0x124   : > { %3036 = vmatpush3.msk.msra.mxu0 %vm575_vm0, %v2749_v17  ;;  %3049 = vmatprep.subr.msk.mxu1 %vm575_vm0, %v2759_v24 }
 0x125   : > { %2999 = vmatmul.mubr.msk.f32.gmra.mxu1 %vm550_vm2, %v3486_v61  ;;  %3063 = vmatprep.subr.msk.mxu0 %vm575_vm0, %v2242_v30 }
 0x126   : > { %3013 = vmatmul.mubr.msk.f32.gmra.mxu0 %vm550_vm2, %v1173_v19  ;;  %3001 = vmatprep.mubr.msk.f32.mxu1 %vm550_vm2, %v3494_v63 }
 0x127   : > { %3015 = vmatprep.mubr.msk.f32.mxu0 %vm550_vm2, %v1174_v20 }
 0x129   : > { %3002 = vmatmul.mubr.msk.f32.gmra.mxu1 %vm550_vm2, %v3502_v1 }
 0x12a   : > { %3016 = vmatmul.mubr.msk.f32.gmra.mxu0 %vm550_vm2, %v1175_v21  ;;  %3004 = vmatprep.mubr.msk.f32.mxu1 %vm550_vm2, %v3510_v11 }
 0x12b   : > { %3018 = vmatprep.mubr.msk.f32.mxu0 %vm550_vm2, %v1176_v22 }
 0x12d   : > { %3005 = vmatmul.mubr.msk.f32.gmra.mxu1 %vm550_vm2, %v1476_v25 }
 0x12e   : > { %3019 = vmatmul.mubr.msk.f32.gmra.mxu0 %vm550_vm2, %v1626_v26  ;;  %3023 = vmatprep.mubr.msk.f32.mxu1 %vm550_vm2, %v3471_v58 }
 0x12f   : > { %3037 = vmatprep.mubr.msk.f32.mxu0 %vm550_vm2, %v3460_v55 }
 0x131   : > { %3024 = vmatmul.mubr.msk.f32.vlgmr.msra.gmra.mxu1 %vm550_vm2, %v3478_v60 }
 0x132   : > { %3038 = vmatmul.mubr.msk.f32.vlgmr.msra.gmra.mxu0 %vm550_vm2, %v3476_v59  ;;  %3050 = vmatpush3.msk.msra.mxu1 %vm575_vm0, %v2759_v24 }
 0x133   : > { %3026 = vmatprep.mubr.msk.f32.mxu1 %vm550_vm2, %v3488_v62  ;;  %3040 = vmatprep.mubr.msk.f32.mxu0 %vm550_vm2, %v3486_v61 }
 0x134   : > { %3064 = vmatpush3.msk.msra.mxu0 %vm575_vm0, %v2242_v30  ;;  %3077 = vmatprep.subr.msk.mxu1 %vm575_vm0, %v2390_v31 }
 0x135   : > { %3027 = vmatmul.mubr.msk.f32.gmra.mxu1 %vm550_vm2, %v3496_v0 }
 0x136   : > { %3041 = vmatmul.mubr.msk.f32.gmra.mxu0 %vm550_vm2, %v3494_v63  ;;  %3029 = vmatprep.mubr.msk.f32.mxu1 %vm550_vm2, %v3504_v6 }
 0x137   : > { %3043 = vmatprep.mubr.msk.f32.mxu0 %vm550_vm2, %v3502_v1 }
 0x139   : > { %3030 = vmatmul.mubr.msk.f32.gmra.mxu1 %vm550_vm2, %v3512_v12 }
 0x13a   : > { %3044 = vmatmul.mubr.msk.f32.gmra.mxu0 %vm550_vm2, %v3510_v11  ;;  %3032 = vmatprep.mubr.msk.f32.mxu1 %vm550_vm2, %v1326_v23 }
 0x13b   : > { %3046 = vmatprep.mubr.msk.f32.mxu0 %vm550_vm2, %v1476_v25 }
 0x13d   : > { %3033 = vmatmul.mubr.msk.f32.gmra.mxu1 %vm550_vm2, %v1777_v27 }
 0x13e   : > { %3047 = vmatmul.mubr.msk.f32.gmra.mxu0 %vm550_vm2, %v1927_v28  ;;  %3051 = vmatprep.mubr.msk.f32.mxu1 %vm550_vm2, %v3523_v15 }
 0x141   : > { %3052 = vmatmul.mubr.msk.f32.vlgmr.msra.gmra.mxu1 %vm550_vm2, %v1172_v18 }
 0x142   : > { %3054 = vmatprep.mubr.msk.f32.mxu1 %vm550_vm2, %v1173_v19  ;;  %3078 = vmatpush3.msk.msra.mxu1 %vm575_vm0, %v2390_v31 }
 0x145   : > { %3055 = vmatmul.mubr.msk.f32.gmra.mxu1 %vm550_vm2, %v1174_v20 }
 0x146   : > { %3057 = vmatprep.mubr.msk.f32.mxu1 %vm550_vm2, %v1175_v21 }
 0x149   : > { %3058 = vmatmul.mubr.msk.f32.gmra.mxu1 %vm550_vm2, %v1176_v22 }
 0x14a   : > { %3060 = vmatprep.mubr.msk.f32.mxu1 %vm550_vm2, %v1626_v26 }
 0x14d   : > { %3061 = vmatmul.mubr.msk.f32.gmra.mxu1 %vm550_vm2, %v2077_v29 }
 0x14e   : > { %3079 = vmatprep.mubr.msk.f32.mxu1 %vm550_vm2, %v3360_v2 }
 0x151   : > { %3080 = vmatmul.mubr.msk.f32.vlgmr.msra.gmra.mxu1 %vm550_vm2, %v3362_v3 }
 0x152   : > { %3082 = vmatprep.mubr.msk.f32.mxu1 %vm550_vm2, %v3364_v4 }
 0x155   : > { %3083 = vmatmul.mubr.msk.f32.gmra.mxu1 %vm550_vm2, %v3376_v5 }
 0x156   : > { %3085 = vmatprep.mubr.msk.f32.mxu1 %vm550_vm2, %v3378_v7 }
 0x159   : > { %3086 = vmatmul.mubr.msk.f32.gmra.mxu1 %vm550_vm2, %v3385_v8 }
 0x15a   : > { %3088 = vmatprep.mubr.msk.f32.mxu1 %vm550_vm2, %v3387_v9 }
 0x15d   : > { %3089 = vmatmul.mubr.msk.f32.gmra.mxu1 %vm550_vm2, %v3393_v10 }
 0x1c1   : > { %v2941_v2 = vpop.f32.mrf.mxu1 }
 0x1c2   : > { %v2955_v3 = vpop.f32.mrf.mxu0 }
 0x1c3   : > { %v998_v32 = vpop.f32.mrf.mxu1  ;;  %v1136_v14 = vadd.f32 %v2955_v3, %v2941_v2 }
 0x1c4   : > { %v1130_v33 = vpop.f32.mrf.mxu0 }
 0x1c5   : > { %v2944_v4 = vpop.f32.mrf.mxu1  ;;  %v1131_v17 = vadd.f32 %v1130_v33, %v998_v32 }
 0x1c6   : > { %v2958_v34 = vpop.f32.mrf.mxu0 }
 0x1c7   : > { %v1008_v35 = vpop.f32.mrf.mxu1  ;;  %v1146_v21 = vadd.f32 %v2958_v34, %v2944_v4 }
 0x1c8   : > { %v1140_v5 = vpop.f32.mrf.mxu0 }
 0x1c9   : > { %v2947_v36 = vpop.f32.mrf.mxu1  ;;  %v1141_v24 = vadd.f32 %v1140_v5, %v1008_v35 }
 0x1ca   : > { %v2961_v37 = vpop.f32.mrf.mxu0 }
 0x1cb   : > { %v1018_v7 = vpop.f32.mrf.mxu1  ;;  %v1156_v29 = vadd.f32 %v2961_v37, %v2947_v36 }
 0x1cc   : > { %v1150_v38 = vpop.f32.mrf.mxu0 }
 0x1cd   : > { %v2950_v39 = vpop.f32.mrf.mxu1  ;;  %v1151_v3 = vadd.f32 %v1150_v38, %v1018_v7 }
 0x1ce   : > { %v2964_v8 = vpop.f32.mrf.mxu0 }
 0x1cf   : > { %v3647_v40 = vpop.f32.mrf.mxu1  ;;  %v1166_v33 = vadd.f32 %v2964_v8, %v2950_v39 }
 0x1d0   : > { %v1160_v9 = vpop.f32.mrf.mxu0 }
 0x1d1   : > { %v2969_v41 = vpop.f32.mrf.mxu1  ;;  %v1161_v5 = vadd.f32 %v1160_v9, %v3647_v40 }
 0x1d2   : > { %v2983_v42 = vpop.f32.mrf.mxu0  ;;  %v1312_v18 = vadd.f32 %v2969_v41, %v1136_v14 }
 0x1d3   : > { %v1272_v10 = vpop.f32.mrf.mxu1 }
 0x1d4   : > { %v1422_v43 = vpop.f32.mrf.mxu0  ;;  %v1311_v22 = vadd.f32 %v1272_v10, %v1131_v17  ;;  %v1462_v25 = vadd.f32 %v2983_v42, %v1312_v18 }
 0x1d5   : > { %v2972_v44 = vpop.f32.mrf.mxu1 }
 0x1d6   : > { %v2986_v45 = vpop.f32.mrf.mxu0  ;;  %v1314_v26 = vadd.f32 %v2972_v44, %v1146_v21  ;;  %v1461_v30 = vadd.f32 %v1422_v43, %v1311_v22 }
 0x1d7   : > { %v1282_v46 = vpop.f32.mrf.mxu1 }
 0x1d8   : > { %v1432_v47 = vpop.f32.mrf.mxu0  ;;  %v1313_v31 = vadd.f32 %v1282_v46, %v1141_v24 }
 0x1d9   : > { %v2975_v48 = vpop.f32.mrf.mxu1 }
 0x1da   : > { %v2989_v49 = vpop.f32.mrf.mxu0  ;;  %v1463_v4 = vadd.f32 %v1432_v47, %v1313_v31 }
 0x1db   : > { %v1292_v50 = vpop.f32.mrf.mxu1 }
 0x1dc   : > { %v1442_v51 = vpop.f32.mrf.mxu0  ;;  %v1315_v34 = vadd.f32 %v1292_v50, %v1151_v3 }
 0x1dd   : > { %v2978_v52 = vpop.f32.mrf.mxu1 }
 0x1de   : > { %v2992_v53 = vpop.f32.mrf.mxu0  ;;  %v1318_v42 = vadd.f32 %v2978_v52, %v1166_v33 }
 0x1df   : > { %v1302_v54 = vpop.f32.mrf.mxu1 }
 0x1e0   : > { %v3649_v55 = vpop.f32.mrf.mxu0 }
 0x1e1   : > { %v2997_v56 = vpop.f32.mrf.mxu1 }
 0x1e2   : > { %v3011_v57 = vpop.f32.mrf.mxu0 }
 0x1e3   : > { %v1572_v58 = vpop.f32.mrf.mxu1 }
 0x1e4   : > { %v1722_v59 = vpop.f32.mrf.mxu0  ;;  %v1611_v32 = vadd.f32 %v1572_v58, %v1461_v30  ;;  %v1468_v58 = vadd.f32 %v2992_v53, %v1318_v42 }
 0x1e5   : > { %v3000_v60 = vpop.f32.mrf.mxu1 }
 0x1e6   : > { %v3014_v61 = vpop.f32.mrf.mxu0  ;;  %v1761_v37 = vadd.f32 %v1722_v59, %v1611_v32 }
 0x1e7   : > { %v1582_v62 = vpop.f32.mrf.mxu1 }
 0x1e8   : > { %v1732_v63 = vpop.f32.mrf.mxu0  ;;  %v1613_v43 = vadd.f32 %v1582_v62, %v1463_v4 }
 0x1e9   : > { %v3003_v0 = vpop.f32.mrf.mxu1 }
 0x1ea   : > { %v3017_v1 = vpop.f32.mrf.mxu0  ;;  %v1763_v50 = vadd.f32 %v1732_v63, %v1613_v43 }
 0x1eb   : > { %v1592_v6 = vpop.f32.mrf.mxu1 }
 0x1ec   : > { %v3651_v11 = vpop.f32.mrf.mxu0 }
 0x1ed   : > { %3774 = vst [vmem:[#allocation6_spill] sm:$0xff] %v3651_v11  ;;  %v3006_v12 = vpop.f32.mrf.mxu1  ;;  %v1464_v11 = vadd.f32 %v2986_v45, %v1314_v26  ;;  %v1465_v45 = vadd.f32 %v1442_v51, %v1315_v34  ;;  %v2769_v51 = vld [vmem:[%s3762_s6] ss:$0 sm:$0xff] }
 0x1ee   : > { %v3653_v13 = vpop.f32.mrf.mxu0  ;;  %v1618_v9 = vadd.f32 %v3006_v12, %v1468_v58 }
 0x1ef   : > { %3775 = vst [vmem:[#allocation7_spill] sm:$0xff] %v3653_v13  ;;  %v1602_v15 = vpop.f32.mrf.mxu1  ;;  %v1612_v13 = vadd.f32 %v2997_v56, %v1462_v25  ;;  %v1614_v35 = vadd.f32 %v3000_v60, %v1464_v11  ;;  %v1317_v56 = vadd.f32 %v1302_v54, %v1161_v5 }
 0x1f0   : > { %v3655_v16 = vpop.f32.mrf.mxu0 }
 0x1f1   : > { %3776 = vst [vmem:[#allocation8_spill] sm:$0xff] %v3655_v16  ;;  %v3025_v19 = vpop.f32.mrf.mxu1  ;;  %v1316_v16 = vadd.f32 %v2975_v48, %v1156_v29  ;;  %v1762_v10 = vadd.f32 %v3011_v57, %v1612_v13  ;;  %v1764_v48 = vadd.f32 %v3014_v61, %v1614_v35  ;;  %v1615_v57 = vadd.f32 %v1592_v6, %v1465_v45 }
 0x1f2   : > { %v3039_v20 = vpop.f32.mrf.mxu0  ;;  %v1467_v40 = vadd.f32 %v3649_v55, %v1317_v56 }
 0x1f3   : > { %v1873_v23 = vpop.f32.mrf.mxu1  ;;  %v1466_v36 = vadd.f32 %v2989_v49, %v1316_v16  ;;  %v1913_v46 = vadd.f32 %v3025_v19, %v1762_v10 }
 0x1f4   : > { %v2023_v27 = vpop.f32.mrf.mxu0  ;;  %v1912_v8 = vadd.f32 %v1873_v23, %v1761_v37  ;;  %v3777_v13 = vld [vmem:[#allocation6_spill] sm:$0xff] }
 0x1f5   : > { %v3028_v28 = vpop.f32.mrf.mxu1  ;;  %v1616_v39 = vadd.f32 %v3003_v0, %v1466_v36  ;;  %v2063_v60 = vadd.f32 %v3039_v20, %v1913_v46  ;;  %v1617_v0 = vadd.f32 %v1602_v15, %v1467_v40  ;;  %v1765_v63 = vadd.f32 %v3777_v13, %v1615_v57 }
 0x1f6   : > { %v3042_v41 = vpop.f32.mrf.mxu0  ;;  %v1915_v11 = vadd.f32 %v3028_v28, %v1764_v48  ;;  %v2062_v62 = vadd.f32 %v2023_v27, %v1912_v8  ;;  %v3778_v18 = vld [vmem:[#allocation7_spill] sm:$0xff] }
 0x1f7   : > { %v1883_v2 = vpop.f32.mrf.mxu1  ;;  %v1766_v59 = vadd.f32 %v3017_v1, %v1616_v39  ;;  %v1768_v55 = vadd.f32 %v3778_v18, %v1618_v9 }
 0x1f8   : > { %v2033_v7 = vpop.f32.mrf.mxu0  ;;  %v1914_v54 = vadd.f32 %v1883_v2, %v1763_v50  ;;  %v2065_v6 = vadd.f32 %v3042_v41, %v1915_v11  ;;  %v3779_v24 = vld [vmem:[#allocation8_spill] sm:$0xff]  ;;  %v2780_v11 = vld [vmem:[%s3766_s10] ss:$0 sm:$0xff] }
 0x1f9   : > { %v3031_v14 = vpop.f32.mrf.mxu1  ;;  %v1767_v25 = vadd.f32 %v3779_v24, %v1617_v0 }
 0x1fa   : > { %v3045_v49 = vpop.f32.mrf.mxu0  ;;  %v1917_v16 = vadd.f32 %v3031_v14, %v1766_v59  ;;  %v2064_v1 = vadd.f32 %v2033_v7, %v1914_v54 }
 0x1fb   : > { %v1893_v44 = vpop.f32.mrf.mxu1 }
 0x1fc   : > { %v2043_v12 = vpop.f32.mrf.mxu0  ;;  %v1916_v21 = vadd.f32 %v1893_v44, %v1765_v63  ;;  %v2067_v27 = vadd.f32 %v3045_v49, %v1917_v16 }
 0x1fd   : > { %v3034_v38 = vpop.f32.mrf.mxu1 }
 0x1fe   : > { %v1919_v15 = vadd.f32 %v3034_v38, %v1768_v55  ;;  %v3048_v30 = vpop.f32.mrf.mxu0  ;;  %v2066_v32 = vadd.f32 %v2043_v12, %v1916_v21 }
 0x1ff   : > { %v1903_v47 = vpop.f32.mrf.mxu1 }
 0x200   : > { %v1918_v33 = vadd.f32 %v1903_v47, %v1767_v25  ;;  %v2069_v34 = vadd.f32 %v3048_v30, %v1919_v15  ;;  %v2053_v5 = vpop.f32.mrf.mxu0 }
 0x201   : > { %v3053_v52 = vpop.f32.mrf.mxu1 }
 0x202   : > { %v2213_v61 = vadd.f32 %v3053_v52, %v2063_v60  ;;  %v2068_v37 = vadd.f32 %v2053_v5, %v1918_v33  ;;  %v2770_v60 = vld [vmem:[%s3764_s8] ss:$0 sm:$0xff] }
 0x203   : > { %v2173_v53 = vpop.f32.mrf.mxu1 }
 0x204   : > { %v2212_v17 = vadd.f32 %v2173_v53, %v2062_v62  ;;  %v2227_v19 = vadd.f32 %v2769_v51, %v2213_v61 }
 0x205   : > { %v3056_v20 = vpop.f32.mrf.mxu1 }
 0x206   : > { %v2226_v22 = vadd.f32 %v2769_v51, %v2212_v17  ;;  %v2215_v23 = vadd.f32 %v3056_v20, %v2065_v6  ;;  %v2235_v31 = vmax.f32 %v2227_v19, 0.0 }
 0x207   : > { %v2183_v26 = vpop.f32.mrf.mxu1 }
 0x208   : > { %v2234_v28 = vmax.f32 %v2226_v22, 0.0  ;;  %v2214_v29 = vadd.f32 %v2183_v26, %v2064_v1  ;;  %v2229_v2 = vadd.f32 %v2769_v51, %v2215_v23 }
 0x209   : > { %v3059_v3 = vpop.f32.mrf.mxu1 }
 0x20a   : > { %v2228_v41 = vadd.f32 %v2769_v51, %v2214_v29  ;;  %v2217_v14 = vadd.f32 %v3059_v3, %v2067_v27  ;;  %3065 = vmatprep.mubr.msk.f32.mxu0 %vm550_vm2, %v2234_v28  ;;  %v2237_v42 = vmax.f32 %v2229_v2, 0.0 }
 0x20b   : > { %v2193_v4 = vpop.f32.mrf.mxu1  ;;  %3066 = vmatmul.mubr.msk.f32.vlgmr.msra.gmra.mxu0 %vm550_vm2, %v2235_v31 }
 0x20c   : > { %v2236_v10 = vmax.f32 %v2228_v41, 0.0  ;;  %v2216_v35 = vadd.f32 %v2193_v4, %v2066_v32  ;;  %v2231_v44 = vadd.f32 %v2769_v51, %v2217_v14 }
 0x20d   : > { %v3062_v36 = vpop.f32.mrf.mxu1 }
 0x20e   : > { %v2230_v43 = vadd.f32 %v2769_v51, %v2216_v35  ;;  %v2219_v46 = vadd.f32 %v3062_v36, %v2069_v34  ;;  %3068 = vmatprep.mubr.msk.f32.mxu0 %vm550_vm2, %v2236_v10  ;;  %v2239_v45 = vmax.f32 %v2231_v44, 0.0 }
 0x20f   : > { %v2203_v56 = vpop.f32.mrf.mxu1  ;;  %3069 = vmatmul.mubr.msk.f32.gmra.mxu0 %vm550_vm2, %v2237_v42 }
 0x210   : > { %v2238_v7 = vmax.f32 %v2230_v43, 0.0  ;;  %v2218_v38 = vadd.f32 %v2203_v56, %v2068_v37  ;;  %v2233_v48 = vadd.f32 %v2769_v51, %v2219_v46 }
 0x211   : > { %v3081_v47 = vpop.f32.mrf.mxu1 }
 0x212   : > { %v2232_v39 = vadd.f32 %v2769_v51, %v2218_v38  ;;  %3071 = vmatprep.mubr.msk.f32.mxu0 %vm550_vm2, %v2238_v7  ;;  %v2241_v58 = vmax.f32 %v2233_v48, 0.0  ;;  %v2473_v52 = vadd.f32 %v3081_v47, %v2780_v11 }
 0x213   : > { %3072 = vmatmul.mubr.msk.f32.gmra.mxu0 %vm550_vm2, %v2239_v45  ;;  %v2467_v50 = vpop.f32.mrf.mxu1 }
 0x214   : > { %v2240_v8 = vmax.f32 %v2232_v39, 0.0  ;;  %v2468_v61 = vadd.f32 %v2780_v11, %v2467_v50 }
 0x215   : > { %v3084_v57 = vpop.f32.mrf.mxu1 }
 0x216   : > { %3074 = vmatprep.mubr.msk.f32.mxu0 %vm550_vm2, %v2240_v8  ;;  %v2483_v6 = vadd.f32 %v3084_v57, %v2780_v11 }
 0x217   : > { %3075 = vmatmul.mubr.msk.f32.gmra.mxu0 %vm550_vm2, %v2241_v58  ;;  %v2477_v40 = vpop.f32.mrf.mxu1 }
 0x218   : > { %v2478_v19 = vadd.f32 %v2780_v11, %v2477_v40 }
 0x219   : > { %v3087_v62 = vpop.f32.mrf.mxu1 }
 0x21a   : > { %v2493_v23 = vadd.f32 %v3087_v62, %v2780_v11 }
 0x21b   : > { %v2487_v17 = vpop.f32.mrf.mxu1 }
 0x21c   : > { %v2488_v28 = vadd.f32 %v2780_v11, %v2487_v17 }
 0x21d   : > { %v3090_v25 = vpop.f32.mrf.mxu1 }
 0x21e   : > { %v2503_v3 = vadd.f32 %v3090_v25, %v2780_v11 }
 0x21f   : > { %v2497_v33 = vpop.f32.mrf.mxu1 }
 0x220   : > { %v2498_v35 = vadd.f32 %v2780_v11, %v2497_v33 }
 0x2cb   : > { %v3067_v9 = vpop.f32.mrf.mxu0 }
 0x2cc   : > { %v2349_v49 = vadd.f32 %v3067_v9, %v2770_v60 }
 0x2cd   : > { %v2343_v59 = vpop.f32.mrf.mxu0 }
 0x2ce   : > { %v2383_v54 = vmax.f32 %v2349_v49, 0.0  ;;  %v2344_v51 = vadd.f32 %v2770_v60, %v2343_v59 }
 0x2cf   : > { %v3070_v0 = vpop.f32.mrf.mxu0 }
 0x2d0   : > { %v2507_v53 = vadd.f32 %v2473_v52, %v2383_v54  ;;  %v2382_v13 = vmax.f32 %v2344_v51, 0.0  ;;  %v2359_v63 = vadd.f32 %v3070_v0, %v2770_v60 }
 0x2d1   : > { %v2353_v16 = vpop.f32.mrf.mxu0 }
 0x2d2   : > { %2516 = vst.msk [vmem:[%s3682_s13 + $0x8] sm:$0xff] %vm2514_vm4, %v2507_v53  ;;  %v2506_v18 = vadd.f32 %v2468_v61, %v2382_v13  ;;  %v2385_v55 = vmax.f32 %v2359_v63, 0.0  ;;  %v2354_v12 = vadd.f32 %v2770_v60, %v2353_v16 }
 0x2d3   : > { %v3073_v20 = vpop.f32.mrf.mxu0 }
 0x2d4   : > { %2515 = vst.msk [vmem:[%s3682_s13] sm:$0xff] %vm2514_vm4, %v2506_v18  ;;  %v2509_v1 = vadd.f32 %v2483_v6, %v2385_v55  ;;  %v2384_v21 = vmax.f32 %v2354_v12, 0.0  ;;  %v2369_v22 = vadd.f32 %v3073_v20, %v2770_v60 }
 0x2d5   : > { %v2363_v24 = vpop.f32.mrf.mxu0 }
 0x2d6   : > { %2518 = vst.msk [vmem:[%s3682_s13 + $0x18] sm:$0xff] %vm2514_vm4, %v2509_v1  ;;  %v2508_v26 = vadd.f32 %v2478_v19, %v2384_v21  ;;  %v2387_v27 = vmax.f32 %v2369_v22, 0.0  ;;  %v2364_v15 = vadd.f32 %v2770_v60, %v2363_v24 }
 0x2d7   : > { %v3076_v29 = vpop.f32.mrf.mxu0 }
 0x2d8   : > { %2517 = vst.msk [vmem:[%s3682_s13 + $0x10] sm:$0xff] %vm2514_vm4, %v2508_v26  ;;  %v2511_v30 = vadd.f32 %v2493_v23, %v2387_v27  ;;  %v2386_v31 = vmax.f32 %v2364_v15, 0.0  ;;  %v2379_v2 = vadd.f32 %v3076_v29, %v2770_v60 }
 0x2d9   : > { %v2373_v32 = vpop.f32.mrf.mxu0 }
 0x2da   : > { %2520 = vst.msk [vmem:[%s3682_s13 + $0x28] sm:$0xff] %vm2514_vm4, %v2511_v30  ;;  %v2510_v41 = vadd.f32 %v2488_v28, %v2386_v31  ;;  %v2389_v14 = vmax.f32 %v2379_v2, 0.0  ;;  %v2374_v4 = vadd.f32 %v2770_v60, %v2373_v32 }
 0x2dc   : > { %2519 = vst.msk [vmem:[%s3682_s13 + $0x20] sm:$0xff] %vm2514_vm4, %v2510_v41  ;;  %v2513_v34 = vadd.f32 %v2503_v3, %v2389_v14  ;;  %v2388_v10 = vmax.f32 %v2374_v4, 0.0 }
 0x2de   : > { %2522 = vst.msk [vmem:[%s3682_s13 + $0x38] sm:$0xff] %vm2514_vm4, %v2513_v34  ;;  %v2512_v5 = vadd.f32 %v2498_v35, %v2388_v10 }
 0x2e0   : > { %2521 = vst.msk [vmem:[%s3682_s13 + $0x30] sm:$0xff] %vm2514_vm4, %v2512_v5 }
 0x2e1   : > { %3163 = shalt.err (!%p3160_p5)
}
 0x2e2   : > { %s3164_s24 = scalar_lea.hbm %s3701_s26, 1024  ;;  %s3168_s12 = scalar_lea.hbm %s3767_s11, 2048 }
 0x2e3   : > { %p3165_p6 = scmp.ne.s32.totalorder %s3701_s26, %s3164_s24  ;;  %p3169_p10 = scmp.lt.s32.totalorder %s3701_s26, %s3767_s11 }
 0x2e4   : > { %p3170_p11 = scmp.lt.s32.totalorder %s3168_s12, %s3164_s24 }
 0x2e5   : > { %p3166_p7 = pnand %p3165_p6, %p3333_p4 }
 0x2e6   : > { %p3171_p12 = por %p3170_p11, %p3169_p10 }
 0x2e7   : > { %p3167_p9 = pneg %p3166_p7 }
 0x2e9   : > { %p3172_p13 = pnand %p3171_p12, %p3167_p9 }
 0x2eb   : > { %3175 = shalt.err (!%p3172_p13)
}
 0x2ec   : > { %s3231_s28 = smov 128   ;;  %s3232_s14 = smov 8  }
 0x2ed   : > { %3091 = dma.vmem_to_hbm [thread:$0]  (%p3333_p4), %s3703_s16, 1024, %s3701_s26, %s3711_s20, %s3231_s28, %s3231_s28, %s3232_s14  }
 0x2ee PF: > { %p3097_p0 = scmp.ge.s32.totalorder %s3226_s22, 2  ;;  %s2554_s23 = sand.u32 1, %s3206_s17  }
 0x2ef   : > { %s2555_s0 = scalar_lea.sflag [#allocation4], %s2554_s23 }
 0x2f0   : > { %p3094_p1 = pnand %p3097_p0, %p3340_p8 }
 0x2f2   : > { %p3095_p2 = pneg %p3094_p1 }
 0x2f4   : > { %3201 = dma.done.wait (%p3095_p2), %s2555_s0, 1024  }
 0x2f5   : > { %3203 = vsyncadd (%p3095_p2), %s2555_s0, 4294966272  ;;  %s24_s22 = sadd.s32 1, %s3226_s22   ;;  %s3780_s17 = smov %s3210_s18 }
 0x2f6   : > { %p21_p3 = scmp.ge.s32.totalorder %s24_s22, 4   ;;  %s3781_s18 = smov %s3214_s19 }
 0x2f7   : > { %s3782_s19 = smov %s3346_s30  ;;  %s3783_s20 = smov %s3222_s21 }
 0x2f8   : > { %s3784_s21 = smov %s3786_s25  ;;  %23 = sbr.rel (!%p21_p3) target bundleno = 7 (0x7), region = 116 }
 0x2fd   :  { %2560 = vsyncpa [#allocation4], 1 }
 0x2fe   :  { %2562 = vsyncpa [#allocation4 + $0x1], 1 }

</bundles_post_ra>
